<compile_context>
chip_gen: v5e
topology: v5e:2x2
jax: 0.10.0
libtpu: 0.0.40
codegen_flags: <defaults>
</compile_context>

<pallas_src>
import jax
import jax.numpy as jnp
from jax.experimental import pallas as pl
from jax.experimental.pallas import tpu as pltpu


def _fused_relu_linear_relu_kernel(x_ref, w_ref, b_ref, o_ref):
    # v1 = dropout(x) -> identity (eval mode); v2 = relu(v1), all in f32.
    x = jnp.maximum(x_ref[...], 0.0)
    # Block-diagonal packed Linear: full-f32 MXU matmul.  HIGHEST precision is
    # free here (launch/store bound) and matches the f32 PyTorch reference.
    y = jnp.dot(x, w_ref[...], preferred_element_type=jnp.float32,
                precision=jax.lax.Precision.HIGHEST)
    # fc bias + final relu, lane-dense unmasked store.
    o_ref[...] = jnp.maximum(y + b_ref[...], 0.0)


def make_fused_forward(weight, bias, *, grid_steps=1):
    """Builds a jitted forward(x) computing relu(linear(relu(dropout(x)))).

    weight: (out_f, D) float32, bias: (out_f,) float32.
    forward(x): x (B, C, H, D) float32 -> (B, C, H, out_f) float32.
    """
    out_f, d = weight.shape
    pack = max(1, 128 // out_f)            # 16 input rows per 128-lane out row
    kp, np_ = pack * d, pack * out_f       # (512, 128) for the (32 -> 8) fc

    # One-time (per-model) parameter prep, hoisted out of the hot path:
    # block-diagonal weight and lane-tiled bias.
    wt = weight.T.astype(jnp.float32)                               # (D, out_f)
    w_packed = jnp.kron(jnp.eye(pack, dtype=jnp.float32), wt)       # (kp, np_)
    b_packed = jnp.tile(bias.astype(jnp.float32), pack)[None, :]    # (1, np_)

    def forward(x):
        B, C, H, D = x.shape
        assert D == d, "last dim must equal in_features"
        M = B * C * H
        assert M % pack == 0, "B*C*H must be a multiple of the lane pack"
        rows = M // pack

        steps = grid_steps if (grid_steps > 0 and rows % grid_steps == 0
                               and (rows // grid_steps) % 8 == 0) else 1
        tr = rows // steps

        x2d = x.reshape(rows, kp)          # free, contiguous reshape

        cost = pl.CostEstimate(
            flops=2 * M * D * out_f,
            transcendentals=0,
            bytes_accessed=4 * (x2d.size + w_packed.size + b_packed.size
                                + rows * np_))

        out2d = pl.pallas_call(
            _fused_relu_linear_relu_kernel,
            out_shape=jax.ShapeDtypeStruct((rows, np_), jnp.float32),
            grid_spec=pltpu.PrefetchScalarGridSpec(
                num_scalar_prefetch=0,
                grid=(steps,),
                in_specs=[
                    pl.BlockSpec((tr, kp), lambda i: (i, 0)),
                    pl.BlockSpec((kp, np_), lambda i: (0, 0)),
                    pl.BlockSpec((1, np_), lambda i: (0, 0)),
                ],
                out_specs=pl.BlockSpec((tr, np_), lambda i: (i, 0)),
            ),
            compiler_params=pltpu.CompilerParams(
                dimension_semantics=("parallel",)),
            cost_estimate=cost,
        )(x2d, w_packed, b_packed)

        # (rows, 128) -> (B, C, H, out_f): free, contiguous reshape
        # (row r, columns g*8:(g+1)*8  ==  output row 16*r + g).
        return out2d.reshape(B, C, H, out_f)

    return jax.jit(forward)


if __name__ == "__main__":
    key = jax.random.PRNGKey(0)
    k_x, k_w, k_b = jax.random.split(key, 3)

    # Small shapes consistent with the module: in_features = x.size(1) = 32,
    # which must also equal the last dim for the Linear to apply.
    B, C, H, D = 2, 32, 16, 32
    OUT = 8

    x = jax.random.normal(k_x, (B, C, H, D), dtype=jnp.float32)
    # Deterministic Linear(32 -> 8) params (PyTorch-style uniform init bounds).
    bound = 1.0 / (D ** 0.5)
    weight = jax.random.uniform(k_w, (OUT, D), minval=-bound, maxval=bound,
                                dtype=jnp.float32)
    bias = jax.random.uniform(k_b, (OUT,), minval=-bound, maxval=bound,
                              dtype=jnp.float32)

    forward = make_fused_forward(weight, bias)
    out = jax.block_until_ready(forward(x))
    assert out.shape == (B, C, H, OUT)

    # f32 reference (eval-mode dropout = identity).
    ref = jnp.maximum(
        jnp.dot(jnp.maximum(x, 0.0).reshape(-1, D), weight.T,
                precision=jax.lax.Precision.HIGHEST) + bias,
        0.0,
    ).reshape(B, C, H, OUT)
    assert jnp.allclose(out, ref, atol=1e-5, rtol=1e-5)

    print("KERNEL_OK")
</pallas_src>

<mosaic_0001>
module attributes {stable_mosaic.version = 11 : i64} {
  func.func @_fused_relu_linear_relu_kernel(%arg0: i32, %arg1: memref<64x512xf32, #tpu.memory_space<vmem>>, %arg2: memref<512x128xf32, #tpu.memory_space<vmem>>, %arg3: memref<1x128xf32, #tpu.memory_space<vmem>>, %arg4: memref<64x128xf32, #tpu.memory_space<vmem>>) attributes {dimension_semantics = [#tpu.dimension_semantics<parallel>], iteration_bounds = array<i64: 1>, scalar_prefetch = 0 : i64, scratch_operands = 0 : i64, tpu.core_type = #tpu.core_type<tc>, window_params = [{transform_indices = @transform_0, window_bounds = array<i64: 64, 512>}, {pipeline_mode = #tpu.pipeline_mode<synchronous>, transform_indices = @transform_1, window_bounds = array<i64: 512, 128>}, {pipeline_mode = #tpu.pipeline_mode<synchronous>, transform_indices = @transform_2, window_bounds = array<i64: 1, 128>}, {transform_indices = @transform_3, window_bounds = array<i64: 64, 128>}]} {
    %c0 = arith.constant 0 : index
    %c0_0 = arith.constant 0 : index
    %0 = vector.load %arg1[%c0, %c0_0] : memref<64x512xf32, #tpu.memory_space<vmem>>, vector<64x512xf32>
    %cst = arith.constant 0.000000e+00 : f32
    %1 = vector.broadcast %cst : f32 to vector<64x512xf32>
    %2 = arith.maximumf %0, %1 : vector<64x512xf32>
    %c0_1 = arith.constant 0 : index
    %c0_2 = arith.constant 0 : index
    %3 = vector.load %arg2[%c0_1, %c0_2] : memref<512x128xf32, #tpu.memory_space<vmem>>, vector<512x128xf32>
    %cst_3 = arith.constant dense<0.000000e+00> : vector<64x128xf32>
    %4 = tpu.matmul %2, %3, %cst_3 {dimension_numbers = #tpu.dot_dimension_numbers<[1], [0], [0], [1], [0, 0, 1, 1], [], []>, precision = #tpu.contract_precision<fp32>} : vector<64x512xf32>, vector<512x128xf32>, vector<64x128xf32> -> vector<64x128xf32>
    %c0_4 = arith.constant 0 : index
    %c0_5 = arith.constant 0 : index
    %5 = vector.load %arg3[%c0_4, %c0_5] : memref<1x128xf32, #tpu.memory_space<vmem>>, vector<1x128xf32>
    %6 = vector.broadcast %5 : vector<1x128xf32> to vector<64x128xf32>
    %7 = arith.addf %4, %6 : vector<64x128xf32>
    %cst_6 = arith.constant 0.000000e+00 : f32
    %8 = vector.broadcast %cst_6 : f32 to vector<64x128xf32>
    %9 = arith.maximumf %7, %8 : vector<64x128xf32>
    %c0_7 = arith.constant 0 : index
    %c0_8 = arith.constant 0 : index
    %10 = vector.load %arg4[%c0_7, %c0_8] : memref<64x128xf32, #tpu.memory_space<vmem>>, vector<64x128xf32>
    tpu.vector_store %arg4[%c0_7, %c0_8], %9 {strides = array<i32>} : memref<64x128xf32, #tpu.memory_space<vmem>>, vector<64x128xf32>,
    return
  }
  func.func @transform_0(%arg0: i32) -> (i32, i32) {
    %c0_i32 = arith.constant 0 : i32
    %c0_i32_0 = arith.constant 0 : i32
    return %arg0, %c0_i32 : i32, i32
  }
  func.func @transform_1(%arg0: i32) -> (i32, i32) {
    %c0_i32 = arith.constant 0 : i32
    %c0_i32_0 = arith.constant 0 : i32
    %c0_i32_1 = arith.constant 0 : i32
    return %c0_i32, %c0_i32_0 : i32, i32
  }
  func.func @transform_2(%arg0: i32) -> (i32, i32) {
    %c0_i32 = arith.constant 0 : i32
    %c0_i32_0 = arith.constant 0 : i32
    %c0_i32_1 = arith.constant 0 : i32
    return %c0_i32, %c0_i32_0 : i32, i32
  }
  func.func @transform_3(%arg0: i32) -> (i32, i32) {
    %c0_i32 = arith.constant 0 : i32
    %c0_i32_0 = arith.constant 0 : i32
    return %arg0, %c0_i32 : i32, i32
  }
}

</mosaic_0001>

<bundles_post_ra>
// kernel: forward.1
= control target key start
LH: loop header
LB: loop body
LE: loop exit
PB: predicated region body
PF: predicated region fallthrough
CT: control target
= control target key end

     0   :  { %s4298_s1 = inlined_call_operand.vmem [shape: f32[512,128], index: 1, kind: input, shape index: {}]   ;;  %s4299_s0 = inlined_call_operand.vmem [shape: f32[64,512], index: 0, kind: input, shape index: {}]   ;;  %s4300_s2 = inlined_call_operand.vmem [shape: f32[1,128], index: 2, kind: input, shape index: {}]   ;;  %s4301_s3 = inlined_call_operand.vmem [shape: f32[64,128], index: 3, kind: output, shape index: {}]  }
   0x1   :  { %v93_v0 = vld [vmem:[%s4298_s1 + $0x78] sm:$0xff]  ;;  %v92_v1 = vld [vmem:[%s4298_s1 + $0x70] sm:$0xff]  ;;  %v91_v2 = vld [vmem:[%s4298_s1 + $0x68] sm:$0xff] }
   0x2   :  { %v2428_v3 = vand.u32 4294901760, %v93_v0  ;;  %v2430_v4 = vand.u32 4294901760, %v92_v1  ;;  %v2432_v5 = vand.u32 4294901760, %v91_v2  ;;  %v90_v6 = vld [vmem:[%s4298_s1 + $0x60] sm:$0xff]  ;;  %v89_v7 = vld [vmem:[%s4298_s1 + $0x58] sm:$0xff]  ;;  %v88_v8 = vld [vmem:[%s4298_s1 + $0x50] sm:$0xff] }
   0x3   :  { %v2443_v9 = vand.u32 4294901760, %v90_v6  ;;  %v2445_v10 = vand.u32 4294901760, %v89_v7  ;;  %v2447_v11 = vand.u32 4294901760, %v88_v8  ;;  %v87_v12 = vld [vmem:[%s4298_s1 + $0x48] sm:$0xff]  ;;  %v86_v13 = vld [vmem:[%s4298_s1 + $0x40] sm:$0xff]  ;;  %v85_v18 = vld [vmem:[%s4298_s1 + $0x38] sm:$0xff] }
   0x4   :  { %147 = vmatpush.msra.mxu0 %v2428_v3  ;;  %v2457_v14 = vsub.f32 %v93_v0, %v2428_v3  ;;  %v2460_v15 = vsub.f32 %v92_v1, %v2430_v4  ;;  %462 = vmatpush.msra.mxu3 %v2428_v3  ;;  %v2464_v16 = vsub.f32 %v91_v2, %v2432_v5  ;;  %v2466_v17 = vand.u32 4294901760, %v87_v12  ;;  %v84_v26 = vld [vmem:[%s4298_s1 + $0x30] sm:$0xff]  ;;  %v83_v34 = vld [vmem:[%s4298_s1 + $0x28] sm:$0xff]  ;;  %v82_v44 = vld [vmem:[%s4298_s1 + $0x20] sm:$0xff] }
   0x5   :  { %v2472_v19 = vsub.f32 %v90_v6, %v2443_v9  ;;  %v2475_v20 = vsub.f32 %v89_v7, %v2445_v10  ;;  %v2478_v21 = vsub.f32 %v88_v8, %v2447_v11  ;;  %v2485_v25 = vand.u32 4294901760, %v86_v13  ;;  %v81_v48 = vld [vmem:[%s4298_s1 + $0x18] sm:$0xff]  ;;  %v80_v53 = vld [vmem:[%s4298_s1 + $0x10] sm:$0xff]  ;;  %v14_v57 = vld [vmem:[%s4299_s0] sm:$0xff] }
   0x6   :  { %149 = vmatpush.msra.mxu0 %v2430_v4  ;;  %374 = vmatpush.msra.mxu2 %v2457_v14  ;;  %v4315_v22 = vand.u32 4294901760, %v2457_v14  ;;  %v4314_v23 = vand.u32 4294901760, %v2460_v15  ;;  %v4313_v24 = vand.u32 4294901760, %v2464_v16  ;;  %v2492_v28 = vand.u32 4294901760, %v85_v18  ;;  %v79_v62 = vld [vmem:[%s4298_s1 + $0x8] sm:$0xff]  ;;  %v109_v63 = vld [vmem:[%s4298_s1 + $0xf8] sm:$0xff] }
   0x7   :  { %464 = vmatpush.msra.mxu3 %v2430_v4  ;;  %v4312_v27 = vand.u32 4294901760, %v2472_v19  ;;  %v2495_v29 = vsub.f32 %v87_v12, %v2466_v17  ;;  %v4310_v33 = vand.u32 4294901760, %v2475_v20  ;;  %v2513_v35 = vand.u32 4294901760, %v84_v26  ;;  %v18_v7 = vld [vmem:[%s4299_s0 + $0x20] sm:$0xff] }
   0x8   :  { %151 = vmatpush.msra.mxu0 %v2432_v5  ;;  %377 = vmatpush.msra.mxu2 %v2460_v15  ;;  %v246_v30 = vsub.f32 %v2457_v14, %v4315_v22  ;;  %v252_v31 = vsub.f32 %v2460_v15, %v4314_v23  ;;  %v258_v32 = vsub.f32 %v2464_v16, %v4313_v24  ;;  %v4309_v36 = vand.u32 4294901760, %v2478_v21  ;;  %v104_v22 = vld [vmem:[%s4298_s1 + $0xd0] sm:$0xff] }
   0x9   :  { %466 = vmatpush.msra.mxu3 %v2432_v5  ;;  %v264_v39 = vsub.f32 %v2472_v19, %v4312_v27  ;;  %v2522_v40 = vsub.f32 %v86_v13, %v2485_v25  ;;  %v2525_v41 = vand.u32 4294901760, %v83_v34  ;;  %v4307_v42 = vand.u32 4294901760, %v2495_v29 }
   0xa   :  { %153 = vmatpush.msra.mxu0 %v2443_v9  ;;  %v247_v37 = vand.u32 4294901760, %v246_v30  ;;  %380 = vmatpush.msra.mxu2 %v2464_v16  ;;  %v253_v38 = vand.u32 4294901760, %v252_v31  ;;  %v2529_v43 = vsub.f32 %v85_v18, %v2492_v28  ;;  %v259_v45 = vand.u32 4294901760, %v258_v32  ;;  %v78_v18 = vld [vmem:[%s4298_s1] sm:$0xff] }
   0xb   :  { %468 = vmatpush.msra.mxu3 %v2443_v9  ;;  %v270_v46 = vsub.f32 %v2475_v20, %v4310_v33  ;;  %v2541_v47 = vsub.f32 %v84_v26, %v2513_v35  ;;  %v265_v49 = vand.u32 4294901760, %v264_v39  ;;  %v276_v50 = vsub.f32 %v2478_v21, %v4309_v36 }
   0xc   :  { %155 = vmatpush.msra.mxu0 %v2445_v10  ;;  %248 = vmatpush.msra.mxu1 %v247_v37  ;;  %v2550_v51 = vand.u32 4294901760, %v82_v44  ;;  %v4306_v52 = vand.u32 4294901760, %v2522_v40  ;;  %v282_v54 = vsub.f32 %v2495_v29, %v4307_v42  ;;  %v4305_v55 = vand.u32 4294901760, %v2529_v43 }
   0xd   :  { %383 = vmatpush.msra.mxu2 %v2472_v19  ;;  %470 = vmatpush.msra.mxu3 %v2445_v10  ;;  %v2563_v56 = vsub.f32 %v83_v34, %v2525_v41  ;;  %v271_v58 = vand.u32 4294901760, %v270_v46  ;;  %v2569_v59 = vand.u32 4294901760, %v81_v48  ;;  %v2573_v60 = vand.u32 4294901760, %v80_v53  ;;  %v108_v34 = vld [vmem:[%s4298_s1 + $0xf0] sm:$0xff] }
   0xe   :  { %157 = vmatpush.msra.mxu0 %v2447_v11  ;;  %254 = vmatpush.msra.mxu1 %v253_v38  ;;  %v4303_v61 = vand.u32 4294901760, %v2541_v47  ;;  %v277_v0 = vand.u32 4294901760, %v276_v50  ;;  %v288_v1 = vsub.f32 %v2522_v40, %v4306_v52  ;;  %v2587_v2 = vsub.f32 %v82_v44, %v2550_v51 }
   0xf   :  { %386 = vmatpush.msra.mxu2 %v2475_v20  ;;  %472 = vmatpush.msra.mxu3 %v2447_v11  ;;  %v46_v6 = vmax.f32 %v14_v57, 0.0  ;;  %v283_v8 = vand.u32 4294901760, %v282_v54  ;;  %v294_v12 = vsub.f32 %v2529_v43, %v4305_v55  ;;  %v4302_v13 = vand.u32 4294901760, %v2563_v56  ;;  %v107_v57 = vld [vmem:[%s4298_s1 + $0xe8] sm:$0xff] }
  0x10   :  { %159 = vmatpush.msra.mxu0 %v2466_v17  ;;  %260 = vmatpush.msra.mxu1 %v259_v45  ;;  %v2602_v26 = vand.u32 4294901760, %v79_v62  ;;  %v2605_v30 = vsub.f32 %v81_v48, %v2569_v59  ;;  %v2609_v32 = vand.u32 4294901760, %v109_v63  ;;  %v300_v37 = vsub.f32 %v2541_v47, %v4303_v61 }
  0x11   :  { %389 = vmatpush.msra.mxu2 %v2478_v21  ;;  %474 = vmatpush.msra.mxu3 %v2466_v17  ;;  %v2607_v31 = vand.u32 4294901760, %v46_v6  ;;  %v2620_v38 = vsub.f32 %v80_v53, %v2573_v60  ;;  %v50_v39 = vmax.f32 %v18_v7, 0.0  ;;  %v289_v44 = vand.u32 4294901760, %v288_v1  ;;  %v2653_v7 = vld [vmem:[%s4299_s0 + $0x40] sm:$0xff] }
  0x12   :  { %161 = vmatpush.msra.mxu0 %v2485_v25  ;;  %266 = vmatpush.msra.mxu1 %v265_v49  ;;  %v2623_v45 = vand.u32 4294901760, %v78_v18  ;;  %v4304_v46 = vand.u32 4294901760, %v2587_v2  ;;  %v295_v49 = vand.u32 4294901760, %v294_v12  ;;  %v306_v50 = vsub.f32 %v2563_v56, %v4302_v13 }
  0x13   :  { %392 = vmatpush.msra.mxu2 %v2495_v29  ;;  %476 = vmatpush.msra.mxu3 %v2485_v25  ;;  %v2627_v48 = vsub.f32 %v46_v6, %v2607_v31  ;;  %v2634_v53 = vand.u32 4294901760, %v50_v39  ;;  %v2636_v54 = vand.u32 4294901760, %v108_v34  ;;  %v2645_v1 = vsub.f32 %v79_v62, %v2602_v26 }
  0x14   :  { %163 = vmatpush.msra.mxu0 %v2492_v28  ;;  %272 = vmatpush.msra.mxu1 %v271_v58  ;;  %4363 = vst [vmem:[#allocation2_spill] sm:$0xff] %v2623_v45  ;;  %v2648_v6 = vsub.f32 %v109_v63, %v2609_v32  ;;  %v301_v12 = vand.u32 4294901760, %v300_v37  ;;  %v312_v62 = vsub.f32 %v2587_v2, %v4304_v46  ;;  %v2668_v61 = vand.u32 4294901760, %v107_v57  ;;  %v106_v37 = vld [vmem:[%s4298_s1 + $0xe0] sm:$0xff] }
  0x15   :  { %395 = vmatpush.msra.mxu2 %v2522_v40  ;;  %478 = vmatpush.msra.mxu3 %v2492_v28  ;;  %v4316_v58 = vand.u32 4294901760, %v2627_v48  ;;  %v2663_v63 = vsub.f32 %v78_v18, %v2623_v45  ;;  %v2666_v13 = vsub.f32 %v108_v34, %v2636_v54  ;;  %v2679_v18 = vsub.f32 %v50_v39, %v2634_v53 }
  0x16   :  { %165 = vmatpush.msra.mxu0 %v2513_v35  ;;  %278 = vmatpush.msra.mxu1 %v277_v0  ;;  %v4308_v0 = vand.u32 4294901760, %v2605_v30  ;;  %4364 = vst [vmem:[#allocation3_spill] sm:$0xff] %v2648_v6  ;;  %v54_v34 = vmax.f32 %v2653_v7, 0.0  ;;  %v307_v46 = vand.u32 4294901760, %v306_v50  ;;  %v4318_v52 = vand.u32 4294901760, %v2645_v1 }
  0x17   :  { %398 = vmatpush.msra.mxu2 %v2529_v43  ;;  %480 = vmatpush.msra.mxu3 %v2513_v35  ;;  %4365 = vst [vmem:[#allocation4_spill] sm:$0xff] %v2663_v63  ;;  %v4317_v42 = vand.u32 4294901760, %v2648_v6  ;;  %v2693_v7 = vand.u32 4294901760, %v106_v37  ;;  %v313_v50 = vand.u32 4294901760, %v312_v62  ;;  %v4322_v36 = vand.u32 4294901760, %v2666_v13 }
  0x18   :  { %167 = vmatpush.msra.mxu0 %v2525_v41  ;;  %284 = vmatpush.msra.mxu1 %v283_v8  ;;  %v4311_v8 = vand.u32 4294901760, %v2620_v38  ;;  %4366 = vst [vmem:[#allocation5_spill] sm:$0xff] %v2666_v13  ;;  %v318_v55 = vsub.f32 %v2605_v30, %v4308_v0  ;;  %v4319_v0 = vand.u32 4294901760, %v2663_v63  ;;  %v2702_v33 = vsub.f32 %v107_v57, %v2668_v61 }
  0x19   :  { %401 = vmatpush.msra.mxu2 %v2541_v47  ;;  %482 = vmatpush.msra.mxu3 %v2525_v41  ;;  %v2707_v24 = vand.u32 4294901760, %v54_v34  ;;  %v330_v57 = vsub.f32 %v2645_v1, %v4318_v52 }
  0x1a   :  { %169 = vmatpush.msra.mxu0 %v2550_v51  ;;  %290 = vmatpush.msra.mxu1 %v289_v44  ;;  %v181_v44 = vsub.f32 %v2627_v48, %v4316_v58  ;;  %v324_v39 = vsub.f32 %v2620_v38, %v4311_v8  ;;  %v319_v62 = vand.u32 4294901760, %v318_v55  ;;  %v2727_v55 = vsub.f32 %v106_v37, %v2693_v7 }
  0x1b   :  { %404 = vmatpush.msra.mxu2 %v2563_v56  ;;  %484 = vmatpush.msra.mxu3 %v2550_v51  ;;  %4367 = vst [vmem:[#allocation6_spill] sm:$0xff] %v2707_v24  ;;  %v4368_v37 = vand.u32 4294901760, %v2679_v18 }
  0x1c   :  { %171 = vmatpush.msra.mxu0 %v2569_v59  ;;  %296 = vmatpush.msra.mxu1 %v295_v49  ;;  %v105_v49 = vld [vmem:[%s4298_s1 + $0xd8] sm:$0xff]  ;;  %v182_v8 = vand.u32 4294901760, %v181_v44  ;;  %v804_v44 = vsub.f32 %v2648_v6, %v4317_v42  ;;  %v325_v58 = vand.u32 4294901760, %v324_v39  ;;  %v810_v42 = vsub.f32 %v2666_v13, %v4322_v36  ;;  %v103_v39 = vld [vmem:[%s4298_s1 + $0xc8] sm:$0xff] }
  0x1d   :  { %407 = vmatpush.msra.mxu2 %v2587_v2  ;;  %486 = vmatpush.msra.mxu3 %v2569_v59  ;;  %v2719_v23 = vand.u32 4294901760, %v105_v49  ;;  %v2747_v6 = vand.u32 4294901760, %v104_v22  ;;  %v331_v36 = vand.u32 4294901760, %v330_v57  ;;  %v2757_v13 = vand.u32 4294901760, %v103_v39 }
  0x1e   :  { %173 = vmatpush.msra.mxu0 %v2573_v60  ;;  %302 = vmatpush.msra.mxu1 %v301_v12  ;;  %v26_v12 = vld [vmem:[%s4299_s0 + $0x60] sm:$0xff]  ;;  %v811_v57 = vand.u32 4294901760, %v810_v42 }
  0x1f   :  { %410 = vmatpush.msra.mxu2 %v2605_v30  ;;  %488 = vmatpush.msra.mxu3 %v2573_v60  ;;  %v58_v27 = vmax.f32 %v26_v12, 0.0  ;;  %v805_v12 = vand.u32 4294901760, %v804_v44  ;;  %v2751_v52 = vsub.f32 %v105_v49, %v2719_v23  ;;  %v4370_v49 = vand.u32 4294901760, %v2702_v33 }
  0x20   :  { %175 = vmatpush.msra.mxu0 %v2602_v26  ;;  %308 = vmatpush.msra.mxu1 %v307_v46  ;;  %v336_v46 = vsub.f32 %v2663_v63, %v4319_v0  ;;  %v2745_v0 = vsub.f32 %v54_v34, %v2707_v24  ;;  %v102_v34 = vld [vmem:[%s4298_s1 + $0xc0] sm:$0xff] }
  0x21   :  { %413 = vmatpush.msra.mxu2 %v2620_v38  ;;  %490 = vmatpush.msra.mxu3 %v2602_v26  ;;  %v816_v44 = vsub.f32 %v2702_v33, %v4370_v49 }
  0x22   :  { %177 = vmatpush.msra.mxu0 %v2623_v45  ;;  %314 = vmatpush.msra.mxu1 %v313_v50  ;;  %v189_v50 = vsub.f32 %v2679_v18, %v4368_v37 }
  0x23   :  { %183 = vmatmul.f32.vlgmr.msra.gmra.mxu0 %v182_v8  ;;  %416 = vmatpush.msra.mxu2 %v2645_v1  ;;  %v4369_v8 = vand.u32 4294901760, %v2627_v48  ;;  %v817_v49 = vand.u32 4294901760, %v816_v44  ;;  %v4376_v44 = vand.u32 4294901760, %v2464_v16 }
  0x24   :  { %320 = vmatpush.msra.mxu1 %v319_v62  ;;  %492 = vmatpush.msra.mxu3 %v2623_v45  ;;  %v337_v62 = vand.u32 4294901760, %v336_v46  ;;  %v2766_v45 = vand.u32 4294901760, %v58_v27  ;;  %v190_v37 = vand.u32 4294901760, %v189_v50  ;;  %v2779_v46 = vand.u32 4294901760, %v102_v34 }
  0x25   :  { %419 = vmatpush.msra.mxu2 %v2663_v63  ;;  %496 = vmatmul.f32.vlgmr.msra.gmra.mxu3 %v4369_v8  ;;  %v4371_v8 = vand.u32 4294901760, %v2457_v14  ;;  %v4327_v63 = vand.u32 4294901760, %v2745_v0  ;;  %v101_v14 = vld [vmem:[%s4298_s1 + $0xb8] sm:$0xff]  ;;  %v4372_v50 = vand.u32 4294901760, %v2460_v15 }
  0x26   :  { %326 = vmatpush.msra.mxu1 %v325_v58  ;;  %422 = vmatmul.f32.vlgmr.msra.gmra.mxu2 %v2627_v48  ;;  %v2773_v58 = vsub.f32 %v104_v22, %v2747_v6  ;;  %v30_v48 = vld [vmem:[%s4299_s0 + $0x80] sm:$0xff]  ;;  %v4373_v22 = vand.u32 4294901760, %v2727_v55 }
  0x27   :  { %705 = vmatpush.msrb.mxu2 %v2609_v32  ;;  %545 = vmatpush.msrb.mxu0 %v4371_v8  ;;  %v2794_v8 = vsub.f32 %v58_v27, %v2766_v45  ;;  %v197_v15 = vsub.f32 %v2745_v0, %v4327_v63  ;;  %v62_v42 = vmax.f32 %v30_v48, 0.0  ;;  %v4374_v27 = vand.u32 4294901760, %v2751_v52 }
  0x28   :  { %332 = vmatpush.msra.mxu1 %v331_v36  ;;  %806 = vmatpush.msrb.mxu3 %v805_v12  ;;  %v822_v36 = vsub.f32 %v2727_v55, %v4373_v22  ;;  %v2791_v12 = vsub.f32 %v103_v39, %v2757_v13  ;;  %v2801_v22 = vand.u32 4294901760, %v101_v14  ;;  %v100_v39 = vld [vmem:[%s4298_s1 + $0xb0] sm:$0xff]  ;;  %v4377_v16 = vand.u32 4294901760, %v2773_v58 }
  0x29   :  { %707 = vmatpush.msrb.mxu2 %v2636_v54  ;;  %549 = vmatpush.msrb.mxu0 %v4372_v50  ;;  %v2819_v50 = vand.u32 4294901760, %v100_v39 }
  0x2a   :  { %338 = vmatpush.msra.mxu1 %v337_v62  ;;  %812 = vmatpush.msrb.mxu3 %v811_v57  ;;  %v2812_v62 = vsub.f32 %v102_v34, %v2779_v46  ;;  %v4375_v57 = vand.u32 4294901760, %v2679_v18  ;;  %v823_v48 = vand.u32 4294901760, %v822_v36  ;;  %v4330_v63 = vand.u32 4294901760, %v2791_v12  ;;  %v99_v34 = vld [vmem:[%s4298_s1 + $0xa8] sm:$0xff] }
  0x2b   :  { %191 = vmatmul.f32.gmra.mxu0 %v190_v37  ;;  %340 = vmatmul.f32.vlgmr.msra.gmra.mxu1 %v2607_v31  ;;  %v828_v37 = vsub.f32 %v2751_v52, %v4374_v27  ;;  %v198_v27 = vand.u32 4294901760, %v197_v15  ;;  %v834_v36 = vsub.f32 %v2773_v58, %v4377_v16  ;;  %v2850_v16 = vsub.f32 %v100_v39, %v2819_v50 }
  0x2c   :  { %640 = vmatpush.msrb.mxu1 %v2428_v3  ;;  %709 = vmatpush.msrb.mxu2 %v2668_v61  ;;  %v2843_v3 = vand.u32 4294901760, %v99_v34 }
  0x2d   :  { %502 = vmatmul.f32.gmra.mxu3 %v4375_v57  ;;  %553 = vmatpush.msrb.mxu0 %v4376_v44  ;;  %v2831_v57 = vand.u32 4294901760, %v62_v42  ;;  %v829_v15 = vand.u32 4294901760, %v828_v37 }
  0x2e   :  { %427 = vmatmul.f32.gmra.mxu2 %v2679_v18  ;;  %642 = vmatpush.msrb.mxu1 %v2430_v4  ;;  %v2834_v18 = vsub.f32 %v101_v14, %v2801_v22  ;;  %v34_v4 = vld [vmem:[%s4299_s0 + $0xa0] sm:$0xff]  ;;  %v840_v14 = vsub.f32 %v2791_v12, %v4330_v63 }
  0x2f   :  { %818 = vmatpush.msrb.mxu3 %v817_v49  ;;  %711 = vmatpush.msrb.mxu2 %v2693_v7  ;;  %v4378_v49 = vand.u32 4294901760, %v2472_v19  ;;  %v4380_v19 = vand.u32 4294901760, %v2794_v8  ;;  %v2860_v44 = vsub.f32 %v62_v42, %v2831_v57  ;;  %v4382_v42 = vand.u32 4294901760, %v2745_v0 }
  0x30   :  { %644 = vmatpush.msrb.mxu1 %v2432_v5  ;;  %v4379_v5 = vand.u32 4294901760, %v2475_v20  ;;  %v4328_v39 = vand.u32 4294901760, %v2834_v18  ;;  %v4381_v20 = vand.u32 4294901760, %v2812_v62 }
  0x31   :  { %557 = vmatpush.msrb.mxu0 %v4378_v49  ;;  %824 = vmatpush.msrb.mxu3 %v823_v48  ;;  %v205_v37 = vsub.f32 %v2794_v8, %v4380_v19  ;;  %v66_v49 = vmax.f32 %v34_v4, 0.0  ;;  %v835_v48 = vand.u32 4294901760, %v834_v36  ;;  %v4329_v19 = vand.u32 4294901760, %v2850_v16 }
  0x32   :  { %713 = vmatpush.msrb.mxu2 %v2719_v23  ;;  %646 = vmatpush.msrb.mxu1 %v2443_v9  ;;  %v98_v9 = vld [vmem:[%s4298_s1 + $0xa0] sm:$0xff]  ;;  %v846_v4 = vsub.f32 %v2812_v62, %v4381_v20 }
  0x33   :  { %561 = vmatpush.msrb.mxu0 %v4379_v5  ;;  %344 = vmatmul.f32.gmra.mxu1 %v2634_v53  ;;  %v2873_v36 = vand.u32 4294901760, %v98_v9  ;;  %v841_v5 = vand.u32 4294901760, %v840_v14  ;;  %v2882_v20 = vand.u32 4294901760, %v66_v49  ;;  %v852_v14 = vsub.f32 %v2834_v18, %v4328_v39 }
  0x34   :  { %199 = vmatmul.f32.gmra.mxu0 %v198_v27  ;;  %830 = vmatpush.msrb.mxu3 %v829_v15  ;;  %v2871_v27 = vsub.f32 %v99_v34, %v2843_v3  ;;  %v4383_v15 = vand.u32 4294901760, %v2478_v21  ;;  %v97_v34 = vld [vmem:[%s4298_s1 + $0x98] sm:$0xff] }
  0x35   :  { %648 = vmatpush.msrb.mxu1 %v2445_v10  ;;  %508 = vmatmul.f32.gmra.mxu3 %v4382_v42  ;;  %v206_v10 = vand.u32 4294901760, %v205_v37  ;;  %v4331_v42 = vand.u32 4294901760, %v2860_v44  ;;  %v2895_v21 = vand.u32 4294901760, %v97_v34  ;;  %v4384_v37 = vand.u32 4294901760, %v2495_v29  ;;  %v96_v29 = vld [vmem:[%s4298_s1 + $0x90] sm:$0xff] }
  0x36   :  { %715 = vmatpush.msrb.mxu2 %v2747_v6  ;;  %565 = vmatpush.msrb.mxu0 %v4383_v15  ;;  %v847_v15 = vand.u32 4294901760, %v846_v4  ;;  %v4385_v4 = vand.u32 4294901760, %v2522_v40  ;;  %v95_v40 = vld [vmem:[%s4298_s1 + $0x88] sm:$0xff] }
  0x37   :  { %432 = vmatmul.f32.gmra.mxu2 %v2745_v0  ;;  %836 = vmatpush.msrb.mxu3 %v835_v48  ;;  %v2893_v0 = vsub.f32 %v98_v9, %v2873_v36  ;;  %v4332_v48 = vand.u32 4294901760, %v2871_v27  ;;  %v858_v9 = vsub.f32 %v2850_v16, %v4329_v19  ;;  %v2909_v39 = vsub.f32 %v97_v34, %v2895_v21 }
  0x38   :  { %650 = vmatpush.msrb.mxu1 %v2447_v11  ;;  %717 = vmatpush.msrb.mxu2 %v2757_v13  ;;  %v38_v11 = vld [vmem:[%s4299_s0 + $0xc0] sm:$0xff]  ;;  %v213_v34 = vsub.f32 %v2860_v44, %v4331_v42 }
  0x39   :  { %569 = vmatpush.msrb.mxu0 %v4384_v37  ;;  %842 = vmatpush.msrb.mxu3 %v841_v5  ;;  %v2918_v5 = vsub.f32 %v66_v49, %v2882_v20  ;;  %v853_v37 = vand.u32 4294901760, %v852_v14  ;;  %v70_v19 = vmax.f32 %v38_v11, 0.0  ;;  %v864_v49 = vsub.f32 %v2871_v27, %v4332_v48 }
  0x3a   :  { %652 = vmatpush.msrb.mxu1 %v2466_v17  ;;  %719 = vmatpush.msrb.mxu2 %v2779_v46  ;;  %v2920_v17 = vand.u32 4294901760, %v96_v29  ;;  %v4386_v14 = vand.u32 4294901760, %v2794_v8  ;;  %v859_v11 = vand.u32 4294901760, %v858_v9  ;;  %v214_v63 = vand.u32 4294901760, %v213_v34  ;;  %v42_v34 = vld [vmem:[%s4299_s0 + $0xe0] sm:$0xff] }
  0x3b   :  { %573 = vmatpush.msrb.mxu0 %v4385_v4  ;;  %348 = vmatmul.f32.gmra.mxu1 %v2707_v24  ;;  %v2937_v4 = vand.u32 4294901760, %v95_v40  ;;  %v2953_v9 = vand.u32 4294901760, %v70_v19 }
  0x3c   :  { %207 = vmatmul.f32.gmra.mxu0 %v206_v10  ;;  %848 = vmatpush.msrb.mxu3 %v847_v15  ;;  %v2935_v10 = vsub.f32 %v96_v29, %v2920_v17  ;;  %v4387_v15 = vand.u32 4294901760, %v2529_v43  ;;  %v220_v29 = vand.u32 4294901760, %v2918_v5  ;;  %v4389_v43 = vand.u32 4294901760, %v2541_v47 }
  0x3d   :  { %654 = vmatpush.msrb.mxu1 %v2485_v25  ;;  %514 = vmatmul.f32.gmra.mxu3 %v4386_v14  ;;  %v94_v25 = vld [vmem:[%s4298_s1 + $0x80] sm:$0xff]  ;;  %v4388_v14 = vand.u32 4294901760, %v2893_v0  ;;  %v2959_v24 = vsub.f32 %v95_v40, %v2937_v4 }
  0x3e   :  { %721 = vmatpush.msrb.mxu2 %v2801_v22  ;;  %577 = vmatpush.msrb.mxu0 %v4387_v15  ;;  %v2950_v48 = vand.u32 4294901760, %v94_v25  ;;  %v221_v47 = vsub.f32 %v2918_v5, %v220_v29 }
  0x3f   :  { %437 = vmatmul.f32.gmra.mxu2 %v2794_v8  ;;  %854 = vmatpush.msrb.mxu3 %v853_v37  ;;  %v870_v42 = vsub.f32 %v2893_v0, %v4388_v14  ;;  %v865_v8 = vand.u32 4294901760, %v864_v49  ;;  %v4390_v37 = vand.u32 4294901760, %v2909_v39  ;;  %v4391_v49 = vand.u32 4294901760, %v2563_v56 }
  0x40   :  { %656 = vmatpush.msrb.mxu1 %v2492_v28  ;;  %723 = vmatpush.msrb.mxu2 %v2819_v50  ;;  %v881_v28 = vand.u32 4294901760, %v2935_v10  ;;  %v2973_v15 = vsub.f32 %v94_v25, %v2950_v48  ;;  %v74_v14 = vmax.f32 %v42_v34, 0.0 }
  0x41   :  { %581 = vmatpush.msrb.mxu0 %v4389_v43  ;;  %860 = vmatpush.msrb.mxu3 %v859_v11  ;;  %v876_v40 = vsub.f32 %v2909_v39, %v4390_v37  ;;  %v227_v11 = vsub.f32 %v70_v19, %v2953_v9  ;;  %v887_v43 = vand.u32 4294901760, %v2959_v24  ;;  %v4392_v37 = vand.u32 4294901760, %v2860_v44 }
  0x42   :  { %658 = vmatpush.msrb.mxu1 %v2513_v35  ;;  %725 = vmatpush.msrb.mxu2 %v2843_v3  ;;  %v871_v35 = vand.u32 4294901760, %v870_v42  ;;  %v882_v25 = vsub.f32 %v2935_v10, %v881_v28  ;;  %v4393_v19 = vand.u32 4294901760, %v2587_v2  ;;  %v222_v42 = vand.u32 4294901760, %v221_v47 }
  0x43   :  { %585 = vmatpush.msrb.mxu0 %v4391_v49  ;;  %352 = vmatmul.f32.gmra.mxu1 %v2766_v45  ;;  %v877_v56 = vand.u32 4294901760, %v876_v40  ;;  %v888_v34 = vsub.f32 %v2959_v24, %v887_v43  ;;  %v4394_v40 = vand.u32 4294901760, %v2605_v30 }
  0x44   :  { %215 = vmatmul.f32.gmra.mxu0 %v214_v63  ;;  %866 = vmatpush.msrb.mxu3 %v865_v8  ;;  %v893_v63 = vand.u32 4294901760, %v2973_v15  ;;  %v228_v8 = vand.u32 4294901760, %v227_v11 }
  0x45   :  { %660 = vmatpush.msrb.mxu1 %v2525_v41  ;;  %520 = vmatmul.f32.gmra.mxu3 %v4392_v37  ;;  %v2994_v41 = vand.u32 4294901760, %v74_v14  ;;  %v889_v49 = vand.u32 4294901760, %v888_v34  ;;  %v4402_v34 = vld [vmem:[#allocation5_spill] sm:$0xff] }
  0x46   :  { %727 = vmatpush.msrb.mxu2 %v2873_v36  ;;  %589 = vmatpush.msrb.mxu0 %v4393_v19  ;;  %v894_v2 = vsub.f32 %v2973_v15, %v893_v63  ;;  %v229_v47 = vsub.f32 %v227_v11, %v228_v8 }
  0x47   :  { %442 = vmatmul.f32.gmra.mxu2 %v2860_v44  ;;  %872 = vmatpush.msrb.mxu3 %v871_v35  ;;  %v883_v44 = vand.u32 4294901760, %v882_v25  ;;  %v235_v30 = vsub.f32 %v74_v14, %v2994_v41 }
  0x48   :  { %662 = vmatpush.msrb.mxu1 %v2550_v51  ;;  %729 = vmatpush.msrb.mxu2 %v2895_v21  ;;  %v4395_v51 = vand.u32 4294901760, %v2620_v38  ;;  %v895_v35 = vand.u32 4294901760, %v894_v2  ;;  %v4396_v38 = vand.u32 4294901760, %v2645_v1  ;;  %v230_v37 = vand.u32 4294901760, %v229_v47 }
  0x49   :  { %593 = vmatpush.msrb.mxu0 %v4394_v40  ;;  %878 = vmatpush.msrb.mxu3 %v877_v56  ;;  %v236_v14 = vand.u32 4294901760, %v235_v30  ;;  %v4397_v56 = vld [vmem:[#allocation4_spill] sm:$0xff]  ;;  %v4403_v40 = vand.u32 4294901760, %v4402_v34  ;;  %v4404_v47 = vand.u32 4294901760, %v2702_v33 }
  0x4a   :  { %664 = vmatpush.msrb.mxu1 %v2569_v59  ;;  %731 = vmatpush.msrb.mxu2 %v2920_v17  ;;  %v15_v59 = vld [vmem:[%s4299_s0 + $0x8] sm:$0xff]  ;;  %v4398_v19 = vand.u32 4294901760, %v4397_v56 }
  0x4b   :  { %597 = vmatpush.msrb.mxu0 %v4395_v51  ;;  %356 = vmatmul.f32.gmra.mxu1 %v2831_v57  ;;  %v47_v25 = vmax.f32 %v15_v59, 0.0  ;;  %v237_v1 = vsub.f32 %v235_v30, %v236_v14 }
  0x4c   :  { %223 = vmatmul.f32.gmra.mxu0 %v222_v42  ;;  %884 = vmatpush.msrb.mxu3 %v883_v44 }
  0x4d   :  { %666 = vmatpush.msrb.mxu1 %v2573_v60  ;;  %526 = vmatmul.f32.gmra.mxu3 %v220_v29  ;;  %v4399_v60 = vld [vmem:[#allocation2_spill] sm:$0xff]  ;;  %v3024_v29 = vand.u32 4294901760, %v47_v25  ;;  %v238_v51 = vand.u32 4294901760, %v237_v1 }
  0x4e   :  { %733 = vmatpush.msrb.mxu2 %v2937_v4  ;;  %601 = vmatpush.msrb.mxu0 %v4396_v38 }
  0x4f   :  { %447 = vmatmul.f32.gmra.mxu2 %v2918_v5  ;;  %890 = vmatpush.msrb.mxu3 %v889_v49  ;;  %v4400_v5 = vld [vmem:[#allocation3_spill] sm:$0xff]  ;;  %v3038_v44 = vsub.f32 %v47_v25, %v3024_v29 }
  0x50   :  { %668 = vmatpush.msrb.mxu1 %v2602_v26  ;;  %605 = vmatpush.msrb.mxu0 %v4398_v19  ;;  %v4401_v42 = vand.u32 4294901760, %v4400_v5  ;;  %v19_v26 = vld [vmem:[%s4299_s0 + $0x28] sm:$0xff] }
  0x51   :  { %735 = vmatpush.msrb.mxu2 %v2950_v48  ;;  %896 = vmatpush.msrb.mxu3 %v895_v35  ;;  %v51_v2 = vmax.f32 %v19_v26, 0.0 }
  0x52   :  { %670 = vmatpush.msrb.mxu1 %v4399_v60  ;;  %932 = vmatpush.msra.mxu0 %v4400_v5 }
  0x53   :  { %1103 = vmatpush.msra.mxu2 %v4401_v42  ;;  %360 = vmatmul.f32.gmra.mxu1 %v2882_v20 }
  0x54   :  { %231 = vmatmul.f32.gmra.mxu0 %v230_v37  ;;  %1198 = vmatpush.msra.mxu3 %v2609_v32 }
  0x55   :  { %1020 = vmatpush.msra.mxu1 %v2609_v32  ;;  %532 = vmatmul.f32.gmra.mxu3 %v228_v8  ;;  %v738_v32 = vand.u32 4294901760, %v3038_v44  ;;  %v4405_v8 = vand.u32 4294901760, %v2727_v55 }
  0x56   :  { %1107 = vmatpush.msra.mxu2 %v4403_v40  ;;  %935 = vmatpush.msra.mxu0 %v4402_v34  ;;  %v125_v34 = vld [vmem:[%s4298_s1 + $0x178] sm:$0xff] }
  0x57   :  { %452 = vmatmul.f32.gmra.mxu2 %v227_v11  ;;  %1200 = vmatpush.msra.mxu3 %v2636_v54  ;;  %v3049_v11 = vand.u32 4294901760, %v51_v2 }
  0x58   :  { %1022 = vmatpush.msra.mxu1 %v2636_v54  ;;  %1111 = vmatpush.msra.mxu2 %v4404_v47  ;;  %v739_v54 = vsub.f32 %v3038_v44, %v738_v32 }
  0x59   :  { %938 = vmatpush.msra.mxu0 %v2702_v33  ;;  %1202 = vmatpush.msra.mxu3 %v2668_v61  ;;  %v23_v33 = vld [vmem:[%s4299_s0 + $0x48] sm:$0xff] }
  0x5a   :  { %1024 = vmatpush.msra.mxu1 %v2668_v61  ;;  %1115 = vmatpush.msra.mxu2 %v4405_v8  ;;  %v4406_v61 = vand.u32 4294901760, %v2751_v52  ;;  %v55_v49 = vmax.f32 %v23_v33, 0.0  ;;  %v124_v33 = vld [vmem:[%s4298_s1 + $0x170] sm:$0xff] }
  0x5b   :  { %941 = vmatpush.msra.mxu0 %v2727_v55  ;;  %364 = vmatmul.f32.gmra.mxu1 %v2953_v9  ;;  %v3066_v55 = vsub.f32 %v51_v2, %v3049_v11 }
  0x5c   :  { %239 = vmatmul.f32.gmra.mxu0 %v238_v51  ;;  %1204 = vmatpush.msra.mxu3 %v2693_v7  ;;  %v3077_v35 = vand.u32 4294901760, %v55_v49 }
  0x5d   :  { %1026 = vmatpush.msra.mxu1 %v2693_v7  ;;  %538 = vmatmul.f32.gmra.mxu3 %v236_v14  ;;  %v4407_v7 = vand.u32 4294901760, %v2773_v58  ;;  %v746_v59 = vand.u32 4294901760, %v3066_v55 }
  0x5e   :  { %1119 = vmatpush.msra.mxu2 %v4406_v61  ;;  %944 = vmatpush.msra.mxu0 %v2751_v52  ;;  %v4408_v52 = vand.u32 4294901760, %v2791_v12  ;;  %v3221_v61 = vand.u32 4294901760, %v124_v33 }
  0x5f   :  { %457 = vmatmul.f32.gmra.mxu2 %v235_v30  ;;  %1206 = vmatpush.msra.mxu3 %v2719_v23  ;;  %v740_v30 = vand.u32 4294901760, %v739_v54 }
  0x60   :  { %1028 = vmatpush.msra.mxu1 %v2719_v23  ;;  %1123 = vmatpush.msra.mxu2 %v4407_v7  ;;  %v27_v23 = vld [vmem:[%s4299_s0 + $0x68] sm:$0xff]  ;;  %v3234_v7 = vsub.f32 %v124_v33, %v3221_v61 }
  0x61   :  { %947 = vmatpush.msra.mxu0 %v2773_v58  ;;  %1208 = vmatpush.msra.mxu3 %v2747_v6  ;;  %v747_v58 = vsub.f32 %v3066_v55, %v746_v59  ;;  %v59_v38 = vmax.f32 %v27_v23, 0.0 }
  0x62   :  { %1030 = vmatpush.msra.mxu1 %v2747_v6  ;;  %1127 = vmatpush.msra.mxu2 %v4408_v52  ;;  %v4409_v6 = vand.u32 4294901760, %v2812_v62 }
  0x63   :  { %950 = vmatpush.msra.mxu0 %v2791_v12  ;;  %368 = vmatmul.f32.gmra.mxu1 %v2994_v41  ;;  %v3096_v12 = vsub.f32 %v55_v49, %v3077_v35  ;;  %v748_v25 = vand.u32 4294901760, %v747_v58  ;;  %v3107_v14 = vand.u32 4294901760, %v59_v38 }
  0x64   :  { %607 = vmatmul.f32.vlgmr.msrb.gmra.mxu0 %v2607_v31  ;;  %1210 = vmatpush.msra.mxu3 %v2757_v13 }
  0x65   :  { %1032 = vmatpush.msra.mxu1 %v2757_v13  ;;  %898 = vmatmul.f32.vlgmr.msrb.gmra.mxu3 %v3024_v29  ;;  %v4410_v13 = vand.u32 4294901760, %v2834_v18  ;;  %v754_v37 = vand.u32 4294901760, %v3096_v12 }
  0x66   :  { %1131 = vmatpush.msra.mxu2 %v4409_v6  ;;  %953 = vmatpush.msra.mxu0 %v2812_v62  ;;  %v4411_v62 = vand.u32 4294901760, %v2850_v16  ;;  %v1367_v6 = vand.u32 4294901760, %v3234_v7 }
  0x67   :  { %741 = vmatmul.f32.vlgmr.msrb.gmra.mxu2 %v740_v30  ;;  %1212 = vmatpush.msra.mxu3 %v2779_v46  ;;  %v123_v30 = vld [vmem:[%s4298_s1 + $0x168] sm:$0xff] }
  0x68   :  { %1034 = vmatpush.msra.mxu1 %v2779_v46  ;;  %1135 = vmatpush.msra.mxu2 %v4410_v13  ;;  %v31_v46 = vld [vmem:[%s4299_s0 + $0x88] sm:$0xff]  ;;  %v3241_v23 = vand.u32 4294901760, %v123_v30 }
  0x69   :  { %956 = vmatpush.msra.mxu0 %v2834_v18  ;;  %1214 = vmatpush.msra.mxu3 %v2801_v22  ;;  %v755_v18 = vsub.f32 %v3096_v12, %v754_v37 }
  0x6a   :  { %1036 = vmatpush.msra.mxu1 %v2801_v22  ;;  %1139 = vmatpush.msra.mxu2 %v4411_v62  ;;  %v4412_v22 = vand.u32 4294901760, %v2871_v27  ;;  %v3246_v58 = vsub.f32 %v123_v30, %v3241_v23 }
  0x6b   :  { %959 = vmatpush.msra.mxu0 %v2850_v16  ;;  %672 = vmatmul.f32.vlgmr.msrb.gmra.mxu1 %v2607_v31  ;;  %v3126_v31 = vsub.f32 %v59_v38, %v3107_v14  ;;  %v63_v16 = vmax.f32 %v31_v46, 0.0  ;;  %v756_v56 = vand.u32 4294901760, %v755_v18  ;;  %v122_v46 = vld [vmem:[%s4298_s1 + $0x160] sm:$0xff] }
  0x6c   :  { %611 = vmatmul.f32.gmra.mxu0 %v2634_v53  ;;  %1216 = vmatpush.msra.mxu3 %v2819_v50  ;;  %v1373_v62 = vand.u32 4294901760, %v3246_v58  ;;  %v3261_v18 = vand.u32 4294901760, %v122_v46 }
  0x6d   :  { %1038 = vmatpush.msra.mxu1 %v2819_v50  ;;  %902 = vmatmul.f32.gmra.mxu3 %v3049_v11  ;;  %v4413_v50 = vand.u32 4294901760, %v2893_v0  ;;  %v762_v19 = vand.u32 4294901760, %v3126_v31  ;;  %v3137_v60 = vand.u32 4294901760, %v63_v16 }
  0x6e   :  { %1143 = vmatpush.msra.mxu2 %v4412_v22  ;;  %962 = vmatpush.msra.mxu0 %v2871_v27  ;;  %v4414_v27 = vand.u32 4294901760, %v2909_v39 }
  0x6f   :  { %749 = vmatmul.f32.gmra.mxu2 %v748_v25  ;;  %1218 = vmatpush.msra.mxu3 %v2843_v3  ;;  %v1368_v25 = vsub.f32 %v3234_v7, %v1367_v6 }
  0x70   :  { %1040 = vmatpush.msra.mxu1 %v2843_v3  ;;  %1147 = vmatpush.msra.mxu2 %v4413_v50  ;;  %v4415_v3 = vld [vmem:[#allocation6_spill] sm:$0xff]  ;;  %v3271_v50 = vsub.f32 %v122_v46, %v3261_v18 }
  0x71   :  { %965 = vmatpush.msra.mxu0 %v2893_v0  ;;  %1220 = vmatpush.msra.mxu3 %v2873_v36  ;;  %v35_v0 = vld [vmem:[%s4299_s0 + $0xa8] sm:$0xff]  ;;  %v1369_v22 = vand.u32 4294901760, %v1368_v25 }
  0x72   :  { %1042 = vmatpush.msra.mxu1 %v2873_v36  ;;  %1151 = vmatpush.msra.mxu2 %v4414_v27  ;;  %v67_v36 = vmax.f32 %v35_v0, 0.0  ;;  %v1379_v0 = vand.u32 4294901760, %v3271_v50 }
  0x73   :  { %968 = vmatpush.msra.mxu0 %v2909_v39  ;;  %676 = vmatmul.f32.gmra.mxu1 %v2634_v53  ;;  %v763_v39 = vsub.f32 %v3126_v31, %v762_v19  ;;  %v3156_v53 = vsub.f32 %v63_v16, %v3137_v60  ;;  %v1374_v16 = vsub.f32 %v3246_v58, %v1373_v62 }
  0x74   :  { %615 = vmatmul.f32.gmra.mxu0 %v4415_v3  ;;  %1222 = vmatpush.msra.mxu3 %v2895_v21  ;;  %v3167_v5 = vand.u32 4294901760, %v67_v36 }
  0x75   :  { %1044 = vmatpush.msra.mxu1 %v2895_v21  ;;  %906 = vmatmul.f32.gmra.mxu3 %v3077_v35  ;;  %v764_v21 = vand.u32 4294901760, %v763_v39  ;;  %v1375_v27 = vand.u32 4294901760, %v1374_v16 }
  0x76   :  { %1155 = vmatpush.msra.mxu2 %v881_v28  ;;  %971 = vmatpush.msra.mxu0 %v2935_v10  ;;  %v770_v28 = vand.u32 4294901760, %v3156_v53  ;;  %v3184_v10 = vsub.f32 %v67_v36, %v3167_v5 }
  0x77   :  { %757 = vmatmul.f32.gmra.mxu2 %v756_v56  ;;  %1224 = vmatpush.msra.mxu3 %v2920_v17  ;;  %v121_v56 = vld [vmem:[%s4298_s1 + $0x158] sm:$0xff] }
  0x78   :  { %1046 = vmatpush.msra.mxu1 %v2920_v17  ;;  %1159 = vmatpush.msra.mxu2 %v887_v43  ;;  %v771_v17 = vsub.f32 %v3156_v53, %v770_v28  ;;  %v4344_v43 = vand.u32 4294901760, %v3184_v10 }
  0x79   :  { %974 = vmatpush.msra.mxu0 %v2959_v24  ;;  %1226 = vmatpush.msra.mxu3 %v2937_v4  ;;  %v39_v24 = vld [vmem:[%s4299_s0 + $0xc8] sm:$0xff] }
  0x7a   :  { %1048 = vmatpush.msra.mxu1 %v2937_v4  ;;  %1163 = vmatpush.msra.mxu2 %v893_v63  ;;  %v71_v4 = vmax.f32 %v39_v24, 0.0  ;;  %v779_v42 = vsub.f32 %v3184_v10, %v4344_v43 }
  0x7b   :  { %977 = vmatpush.msra.mxu0 %v2973_v15  ;;  %680 = vmatmul.f32.gmra.mxu1 %v4415_v3  ;;  %v772_v15 = vand.u32 4294901760, %v771_v17  ;;  %v3278_v3 = vand.u32 4294901760, %v121_v56  ;;  %v120_v17 = vld [vmem:[%s4298_s1 + $0x150] sm:$0xff] }
  0x7c   :  { %619 = vmatmul.f32.gmra.mxu0 %v2766_v45  ;;  %1228 = vmatpush.msra.mxu3 %v2950_v48  ;;  %v3187_v63 = vand.u32 4294901760, %v71_v4  ;;  %v780_v2 = vand.u32 4294901760, %v779_v42  ;;  %v119_v42 = vld [vmem:[%s4298_s1 + $0x148] sm:$0xff] }
  0x7d   :  { %1050 = vmatpush.msra.mxu1 %v2950_v48  ;;  %910 = vmatmul.f32.gmra.mxu3 %v3107_v14  ;;  %v43_v48 = vld [vmem:[%s4299_s0 + $0xe8] sm:$0xff]  ;;  %v3283_v39 = vsub.f32 %v121_v56, %v3278_v3 }
  0x7e   :  { %v3199_v1 = vsub.f32 %v71_v4, %v3187_v63  ;;  %v75_v26 = vmax.f32 %v43_v48, 0.0 }
  0x7f   :  { %765 = vmatmul.f32.gmra.mxu2 %v764_v21  ;;  %v1380_v21 = vsub.f32 %v3271_v50, %v1379_v0  ;;  %v1385_v24 = vand.u32 4294901760, %v3283_v39 }
  0x80   :  { %v4338_v51 = vand.u32 4294901760, %v3199_v1  ;;  %v3212_v47 = vand.u32 4294901760, %v75_v26 }
  0x81   :  { %v1381_v4 = vand.u32 4294901760, %v1380_v21  ;;  %v1386_v48 = vsub.f32 %v3283_v39, %v1385_v24 }
  0x82   :  { %v3231_v49 = vsub.f32 %v75_v26, %v3212_v47 }
  0x83   :  { %684 = vmatmul.f32.gmra.mxu1 %v2766_v45  ;;  %v3204_v45 = vand.u32 4294901760, %v125_v34  ;;  %v1387_v26 = vand.u32 4294901760, %v1386_v48 }
  0x84   :  { %623 = vmatmul.f32.gmra.mxu0 %v2831_v57  ;;  %v4335_v13 = vand.u32 4294901760, %v3231_v49 }
  0x85   :  { %914 = vmatmul.f32.gmra.mxu3 %v3137_v60  ;;  %v3207_v40 = vsub.f32 %v125_v34, %v3204_v45  ;;  %1263 = vmatpush.msrb.mxu0 %v3204_v45  ;;  %v3311_v34 = vand.u32 4294901760, %v119_v42 }
  0x86   :  { %1578 = vmatpush.msrb.mxu3 %v3204_v45 }
  0x87   :  { %773 = vmatmul.f32.gmra.mxu2 %v772_v15  ;;  %v1361_v8 = vand.u32 4294901760, %v3207_v40  ;;  %1265 = vmatpush.msrb.mxu0 %v3221_v61  ;;  %v3297_v15 = vand.u32 4294901760, %v120_v17 }
  0x88   :  { %1490 = vmatpush.msrb.mxu2 %v3207_v40  ;;  %1580 = vmatpush.msrb.mxu3 %v3221_v61 }
  0x89   :  { %v1362_v54 = vsub.f32 %v3207_v40, %v1361_v8  ;;  %1267 = vmatpush.msrb.mxu0 %v3241_v23 }
  0x8a   :  { %1493 = vmatpush.msrb.mxu2 %v3234_v7  ;;  %1582 = vmatpush.msrb.mxu3 %v3241_v23 }
  0x8b   :  { %688 = vmatmul.f32.gmra.mxu1 %v2831_v57  ;;  %v787_v57 = vsub.f32 %v3199_v1, %v4338_v51  ;;  %v1363_v52 = vand.u32 4294901760, %v1362_v54  ;;  %1269 = vmatpush.msrb.mxu0 %v3261_v18  ;;  %v3318_v54 = vld [vmem:[%s4300_s2] ss:$0 sm:$0xff] }
  0x8c   :  { %627 = vmatmul.f32.gmra.mxu0 %v2882_v20  ;;  %1496 = vmatpush.msrb.mxu2 %v3246_v58 }
  0x8d   :  { %918 = vmatmul.f32.gmra.mxu3 %v3167_v5  ;;  %1364 = vmatpush.msrb.mxu1 %v1363_v52  ;;  %v788_v38 = vand.u32 4294901760, %v787_v57  ;;  %v3321_v57 = vsub.f32 %v119_v42, %v3311_v34 }
  0x8e   :  { %1584 = vmatpush.msrb.mxu3 %v3261_v18  ;;  %1499 = vmatpush.msrb.mxu2 %v3271_v50 }
  0x8f   :  { %781 = vmatmul.f32.gmra.mxu2 %v780_v2  ;;  %1370 = vmatpush.msrb.mxu1 %v1369_v22  ;;  %v4343_v52 = vand.u32 4294901760, %v3321_v57 }
  0x90   :  { %1271 = vmatpush.msrb.mxu0 %v3278_v3  ;;  %1586 = vmatpush.msrb.mxu3 %v3278_v3 }
  0x91   :  { %1376 = vmatpush.msrb.mxu1 %v1375_v27  ;;  %1502 = vmatpush.msrb.mxu2 %v3283_v39 }
  0x92   :  { %1273 = vmatpush.msrb.mxu0 %v3297_v15  ;;  %1588 = vmatpush.msrb.mxu3 %v3297_v15 }
  0x93   :  { %692 = vmatmul.f32.gmra.mxu1 %v2882_v20  ;;  %v795_v20 = vsub.f32 %v3231_v49, %v4335_v13 }
  0x94   :  { %631 = vmatmul.f32.gmra.mxu0 %v2953_v9  ;;  %1382 = vmatpush.msrb.mxu1 %v1381_v4 }
  0x95   :  { %922 = vmatmul.f32.gmra.mxu3 %v3187_v63  ;;  %v796_v36 = vand.u32 4294901760, %v795_v20  ;;  %1275 = vmatpush.msrb.mxu0 %v3311_v34  ;;  %v117_v20 = vld [vmem:[%s4298_s1 + $0x138] sm:$0xff] }
  0x96   :  { %1388 = vmatpush.msrb.mxu1 %v1387_v26  ;;  %1590 = vmatpush.msrb.mxu3 %v3311_v34  ;;  %v3351_v27 = vand.u32 4294901760, %v117_v20 }
  0x97   :  { %789 = vmatmul.f32.gmra.mxu2 %v788_v38  ;;  %v118_v38 = vld [vmem:[%s4298_s1 + $0x140] sm:$0xff] }
  0x98   :  { %v3335_v46 = vand.u32 4294901760, %v118_v38  ;;  %v3356_v42 = vsub.f32 %v117_v20, %v3351_v27 }
  0x9a   :  { %v3344_v16 = vsub.f32 %v118_v38, %v3335_v46  ;;  %1277 = vmatpush.msrb.mxu0 %v3335_v46  ;;  %1592 = vmatpush.msrb.mxu3 %v3335_v46  ;;  %v116_v38 = vld [vmem:[%s4298_s1 + $0x130] sm:$0xff] }
  0x9b   :  { %696 = vmatmul.f32.gmra.mxu1 %v2953_v9  ;;  %v3304_v9 = vsub.f32 %v120_v17, %v3297_v15 }
  0x9c   :  { %635 = vmatmul.f32.gmra.mxu0 %v2994_v41  ;;  %1594 = vmatpush.msrb.mxu3 %v3351_v27 }
  0x9d   :  { %926 = vmatmul.f32.gmra.mxu3 %v3212_v47  ;;  %1505 = vmatpush.msrb.mxu2 %v3304_v9  ;;  %v4345_v33 = vand.u32 4294901760, %v3304_v9 }
  0x9e   :  { %1279 = vmatpush.msrb.mxu0 %v3351_v27 }
  0x9f   :  { %797 = vmatmul.f32.gmra.mxu2 %v796_v36  ;;  %v1392_v30 = vsub.f32 %v3304_v9, %v4345_v33 }
  0xa0   :  { %v184_v2 = vpop.f32.mrf.mxu0  ;;  %1508 = vmatpush.msrb.mxu2 %v3321_v57 }
  0xa1   :  { %v1393_v25 = vand.u32 4294901760, %v1392_v30  ;;  %v185_v22 = vadd.f32 %v3318_v54, %v184_v2  ;;  %v4340_v30 = vand.u32 4294901760, %v3356_v42 }
  0xa2   :  { %1511 = vmatpush.msrb.mxu2 %v3344_v16 }
  0xa3   :  { %700 = vmatmul.f32.gmra.mxu1 %v2994_v41  ;;  %v1398_v41 = vsub.f32 %v3321_v57, %v4343_v52 }
  0xa4   :  { %980 = vmatmul.f32.vlgmr.msra.gmra.mxu0 %v3038_v44  ;;  %1394 = vmatpush.msrb.mxu1 %v1393_v25  ;;  %v1410_v44 = vsub.f32 %v3356_v42, %v4340_v30 }
  0xa5   :  { %1230 = vmatmul.f32.vlgmr.msra.gmra.mxu3 %v3024_v29  ;;  %v1399_v56 = vand.u32 4294901760, %v1398_v41  ;;  %1514 = vmatpush.msrb.mxu2 %v3356_v42 }
  0xa7   :  { %1165 = vmatmul.f32.vlgmr.msra.gmra.mxu2 %v3024_v29  ;;  %v4342_v29 = vand.u32 4294901760, %v3344_v16  ;;  %1400 = vmatpush.msrb.mxu1 %v1399_v56  ;;  %v115_v56 = vld [vmem:[%s4298_s1 + $0x128] sm:$0xff] }
  0xa8   :  { %v192_v36 = vpop.f32.mrf.mxu0  ;;  %v341_v21 = vpop.f32.mrf.mxu1 }
  0xa9   :  { %v342_v17 = vadd.f32 %v341_v21, %v185_v22  ;;  %v423_v4 = vpop.f32.mrf.mxu2  ;;  %v497_v48 = vpop.f32.mrf.mxu3  ;;  %v1404_v26 = vsub.f32 %v3344_v16, %v4342_v29  ;;  %v3371_v22 = vand.u32 4294901760, %v116_v38  ;;  %v193_v41 = vadd.f32 %v3318_v54, %v192_v36 }
  0xaa   :  { %v1411_v21 = vand.u32 4294901760, %v1410_v44  ;;  %v3389_v36 = vand.u32 4294901760, %v115_v56 }
  0xab   :  { %v424_v2 = vadd.f32 %v423_v4, %v342_v17  ;;  %1054 = vmatmul.f32.vlgmr.msra.gmra.mxu1 %v738_v32  ;;  %v1405_v25 = vand.u32 4294901760, %v1404_v26  ;;  %v3382_v32 = vsub.f32 %v116_v38, %v3371_v22  ;;  %1281 = vmatpush.msrb.mxu0 %v3371_v22 }
  0xac   :  { %985 = vmatmul.f32.gmra.mxu0 %v3066_v55  ;;  %1596 = vmatpush.msrb.mxu3 %v3371_v22  ;;  %v3394_v38 = vsub.f32 %v115_v56, %v3389_v36  ;;  %v114_v56 = vld [vmem:[%s4298_s1 + $0x120] sm:$0xff] }
  0xad   :  { %v3374_v20 = vadd.f32 %v497_v48, %v424_v2  ;;  %1234 = vmatmul.f32.gmra.mxu3 %v3049_v11  ;;  %1406 = vmatpush.msrb.mxu1 %v1405_v25 }
  0xae   :  { %1517 = vmatpush.msrb.mxu2 %v3382_v32  ;;  %1283 = vmatpush.msrb.mxu0 %v3389_v36 }
  0xaf   :  { %1169 = vmatmul.f32.gmra.mxu2 %v3049_v11  ;;  %v4336_v11 = vand.u32 4294901760, %v3382_v32  ;;  %1412 = vmatpush.msrb.mxu1 %v1411_v21 }
  0xb0   :  { %v345_v4 = vpop.f32.mrf.mxu1  ;;  %1598 = vmatpush.msrb.mxu3 %v3389_v36  ;;  %1520 = vmatpush.msrb.mxu2 %v3394_v38 }
  0xb1   :  { %v200_v17 = vpop.f32.mrf.mxu0  ;;  %v346_v48 = vadd.f32 %v345_v4, %v193_v41  ;;  %v428_v26 = vpop.f32.mrf.mxu2  ;;  %v1416_v25 = vsub.f32 %v3382_v32, %v4336_v11  ;;  %v4337_v41 = vand.u32 4294901760, %v3394_v38  ;;  %v3409_v4 = vand.u32 4294901760, %v114_v56 }
  0xb2   :  { %v503_v2 = vpop.f32.mrf.mxu3  ;;  %v201_v13 = vadd.f32 %v3318_v54, %v200_v17 }
  0xb3   :  { %v429_v44 = vadd.f32 %v428_v26, %v346_v48  ;;  %1060 = vmatmul.f32.gmra.mxu1 %v746_v59  ;;  %v1417_v21 = vand.u32 4294901760, %v1416_v25  ;;  %v1422_v55 = vsub.f32 %v3394_v38, %v4337_v41  ;;  %v3420_v59 = vsub.f32 %v114_v56, %v3409_v4  ;;  %v113_v48 = vld [vmem:[%s4298_s1 + $0x118] sm:$0xff]  ;;  %1285 = vmatpush.msrb.mxu0 %v3409_v4 }
  0xb4   :  { %990 = vmatmul.f32.gmra.mxu0 %v3096_v12  ;;  %1600 = vmatpush.msrb.mxu3 %v3409_v4  ;;  %v3427_v17 = vand.u32 4294901760, %v113_v48 }
  0xb5   :  { %v3412_v11 = vadd.f32 %v503_v2, %v429_v44  ;;  %1238 = vmatmul.f32.gmra.mxu3 %v3077_v35  ;;  %1418 = vmatpush.msrb.mxu1 %v1417_v21  ;;  %v1423_v26 = vand.u32 4294901760, %v1422_v55 }
  0xb6   :  { %1523 = vmatpush.msrb.mxu2 %v3420_v59  ;;  %v3432_v41 = vsub.f32 %v113_v48, %v3427_v17  ;;  %1287 = vmatpush.msrb.mxu0 %v3427_v17  ;;  %v112_v48 = vld [vmem:[%s4298_s1 + $0x110] sm:$0xff] }
  0xb7   :  { %1173 = vmatmul.f32.gmra.mxu2 %v3077_v35  ;;  %v4339_v35 = vand.u32 4294901760, %v3420_v59  ;;  %1424 = vmatpush.msrb.mxu1 %v1423_v26 }
  0xb8   :  { %v349_v25 = vpop.f32.mrf.mxu1  ;;  %1602 = vmatpush.msrb.mxu3 %v3427_v17  ;;  %1526 = vmatpush.msrb.mxu2 %v3432_v41 }
  0xb9   :  { %v208_v2 = vpop.f32.mrf.mxu0  ;;  %v350_v44 = vadd.f32 %v349_v25, %v201_v13  ;;  %v1428_v55 = vsub.f32 %v3420_v59, %v4339_v35  ;;  %v4341_v13 = vand.u32 4294901760, %v3432_v41  ;;  %v3447_v25 = vand.u32 4294901760, %v112_v48 }
  0xba   :  { %v433_v56 = vpop.f32.mrf.mxu2  ;;  %v509_v21 = vpop.f32.mrf.mxu3  ;;  %v209_v35 = vadd.f32 %v3318_v54, %v208_v2  ;;  %v110_v2 = vld [vmem:[%s4298_s1 + $0x100] sm:$0xff] }
  0xbb   :  { %v434_v51 = vadd.f32 %v433_v56, %v350_v44  ;;  %1066 = vmatmul.f32.gmra.mxu1 %v754_v37  ;;  %v1429_v26 = vand.u32 4294901760, %v1428_v55  ;;  %v1434_v12 = vsub.f32 %v3432_v41, %v4341_v13  ;;  %v111_v37 = vld [vmem:[%s4298_s1 + $0x108] sm:$0xff]  ;;  %v3461_v44 = vsub.f32 %v112_v48, %v3447_v25  ;;  %1289 = vmatpush.msrb.mxu0 %v3447_v25 }
  0xbc   :  { %995 = vmatmul.f32.gmra.mxu0 %v3126_v31  ;;  %v3463_v56 = vand.u32 4294901760, %v111_v37  ;;  %1604 = vmatpush.msrb.mxu3 %v3447_v25 }
  0xbd   :  { %v3450_v30 = vadd.f32 %v509_v21, %v434_v51  ;;  %1242 = vmatmul.f32.gmra.mxu3 %v3107_v14  ;;  %1430 = vmatpush.msrb.mxu1 %v1429_v26  ;;  %v1435_v51 = vand.u32 4294901760, %v1434_v12  ;;  %v3475_v26 = vand.u32 4294901760, %v110_v2 }
  0xbe   :  { %1529 = vmatpush.msrb.mxu2 %v3461_v44  ;;  %v3473_v48 = vsub.f32 %v111_v37, %v3463_v56  ;;  %1291 = vmatpush.msrb.mxu0 %v3463_v56 }
  0xbf   :  { %1177 = vmatmul.f32.gmra.mxu2 %v3107_v14  ;;  %v4346_v14 = vand.u32 4294901760, %v3461_v44  ;;  %1436 = vmatpush.msrb.mxu1 %v1435_v51  ;;  %v3485_v37 = vsub.f32 %v110_v2, %v3475_v26 }
  0xc0   :  { %v353_v55 = vpop.f32.mrf.mxu1  ;;  %1532 = vmatpush.msrb.mxu2 %v3473_v48  ;;  %1606 = vmatpush.msrb.mxu3 %v3463_v56  ;;  %v1445_v43 = vand.u32 4294901760, %v3473_v48 }
  0xc1   :  { %v216_v21 = vpop.f32.mrf.mxu0  ;;  %v354_v12 = vadd.f32 %v353_v55, %v209_v35  ;;  %v1440_v52 = vsub.f32 %v3461_v44, %v4346_v14  ;;  %1293 = vmatpush.msrb.mxu0 %v3475_v26  ;;  %v1451_v55 = vand.u32 4294901760, %v3485_v37 }
  0xc2   :  { %v438_v13 = vpop.f32.mrf.mxu2  ;;  %v515_v29 = vpop.f32.mrf.mxu3  ;;  %v1446_v51 = vsub.f32 %v3473_v48, %v1445_v43  ;;  %1535 = vmatpush.msrb.mxu2 %v3485_v37  ;;  %v217_v2 = vadd.f32 %v3318_v54, %v216_v21  ;;  %1608 = vmatpush.msrb.mxu3 %v3475_v26 }
  0xc3   :  { %v439_v33 = vadd.f32 %v438_v13, %v354_v12  ;;  %1072 = vmatmul.f32.gmra.mxu1 %v762_v19  ;;  %v1441_v35 = vand.u32 4294901760, %v1440_v52  ;;  %1661 = vmatpush.msra.mxu0 %v1361_v8  ;;  %v1452_v19 = vsub.f32 %v3485_v37, %v1451_v55  ;;  %v141_v52 = vld [vmem:[%s4298_s1 + $0x1f8] sm:$0xff]  ;;  %v131_v37 = vld [vmem:[%s4298_s1 + $0x1a8] sm:$0xff] }
  0xc4   :  { %1000 = vmatmul.f32.gmra.mxu0 %v3156_v53  ;;  %v1447_v31 = vand.u32 4294901760, %v1446_v51 }
  0xc5   :  { %v3497_v14 = vadd.f32 %v515_v29, %v439_v33  ;;  %1246 = vmatmul.f32.gmra.mxu3 %v3137_v60  ;;  %1442 = vmatpush.msrb.mxu1 %v1441_v35  ;;  %v3510_v33 = vand.u32 4294901760, %v141_v52  ;;  %v1453_v29 = vand.u32 4294901760, %v1452_v19  ;;  %v20_v19 = vld [vmem:[%s4299_s0 + $0x30] sm:$0xff] }
  0xc6   :  { %1665 = vmatpush.msra.mxu0 %v1367_v6 }
  0xc7   :  { %1181 = vmatmul.f32.gmra.mxu2 %v3137_v60  ;;  %v16_v60 = vld [vmem:[%s4299_s0 + $0x10] sm:$0xff]  ;;  %1448 = vmatpush.msrb.mxu1 %v1447_v31  ;;  %v3519_v35 = vsub.f32 %v141_v52, %v3510_v33 }
  0xc8   :  { %v357_v8 = vpop.f32.mrf.mxu1  ;;  %1821 = vmatpush.msra.mxu2 %v3510_v33  ;;  %1669 = vmatpush.msra.mxu0 %v1373_v62  ;;  %v48_v6 = vmax.f32 %v16_v60, 0.0 }
  0xc9   :  { %v224_v40 = vpop.f32.mrf.mxu0  ;;  %v358_v13 = vadd.f32 %v357_v8, %v217_v2  ;;  %1454 = vmatpush.msrb.mxu1 %v1453_v29  ;;  %v4360_v51 = vand.u32 4294901760, %v3519_v35  ;;  %v140_v2 = vld [vmem:[%s4298_s1 + $0x1f0] sm:$0xff] }
  0xca   :  { %v443_v21 = vpop.f32.mrf.mxu2  ;;  %v521_v12 = vpop.f32.mrf.mxu3  ;;  %v3531_v31 = vand.u32 4294901760, %v140_v2  ;;  %1673 = vmatpush.msra.mxu0 %v1379_v0  ;;  %v225_v58 = vadd.f32 %v3318_v54, %v224_v40  ;;  %v3550_v50 = vand.u32 4294901760, %v48_v6 }
  0xcb   :  { %v444_v7 = vadd.f32 %v443_v21, %v358_v13  ;;  %1078 = vmatmul.f32.gmra.mxu1 %v770_v28  ;;  %v1920_v53 = vsub.f32 %v3519_v35, %v4360_v51  ;;  %v52_v21 = vmax.f32 %v20_v19, 0.0 }
  0xcc   :  { %1005 = vmatmul.f32.gmra.mxu0 %v3184_v10  ;;  %1756 = vmatpush.msra.mxu1 %v3204_v45  ;;  %v3544_v28 = vsub.f32 %v140_v2, %v3531_v31  ;;  %v139_v45 = vld [vmem:[%s4298_s1 + $0x1e8] sm:$0xff] }
  0xcd   :  { %v3536_v62 = vadd.f32 %v521_v12, %v444_v7  ;;  %1250 = vmatmul.f32.gmra.mxu3 %v3167_v5  ;;  %v1921_v0 = vand.u32 4294901760, %v1920_v53  ;;  %1823 = vmatpush.msra.mxu2 %v3531_v31  ;;  %v3556_v52 = vand.u32 4294901760, %v139_v45  ;;  %v4417_v12 = vand.u32 4294901760, %v3184_v10 }
  0xce   :  { %1758 = vmatpush.msra.mxu1 %v3221_v61  ;;  %1677 = vmatpush.msra.mxu0 %v1385_v24  ;;  %v4359_v40 = vand.u32 4294901760, %v3544_v28  ;;  %v4416_v24 = vand.u32 4294901760, %v3304_v9  ;;  %v3576_v7 = vsub.f32 %v48_v6, %v3550_v50  ;;  %v4418_v9 = vand.u32 4294901760, %v3321_v57  ;;  %v137_v57 = vld [vmem:[%s4298_s1 + $0x1d8] sm:$0xff] }
  0xcf   :  { %1185 = vmatmul.f32.gmra.mxu2 %v3167_v5  ;;  %1922 = vmatpush.msra.mxu3 %v1921_v0  ;;  %v3564_v13 = vsub.f32 %v139_v45, %v3556_v52  ;;  %v3595_v0 = vand.u32 4294901760, %v52_v21 }
  0xd0   :  { %v361_v61 = vpop.f32.mrf.mxu1  ;;  %1760 = vmatpush.msra.mxu1 %v3241_v23  ;;  %1825 = vmatpush.msra.mxu2 %v3556_v52  ;;  %v1926_v39 = vsub.f32 %v3544_v28, %v4359_v40  ;;  %v1296_v19 = vand.u32 4294901760, %v3576_v7 }
  0xd1   :  { %v232_v5 = vpop.f32.mrf.mxu0  ;;  %v362_v8 = vadd.f32 %v361_v61, %v225_v58  ;;  %1681 = vmatpush.msra.mxu0 %v4416_v24  ;;  %v4357_v2 = vand.u32 4294901760, %v3564_v13  ;;  %v138_v58 = vld [vmem:[%s4298_s1 + $0x1e0] sm:$0xff]  ;;  %v3605_v61 = vand.u32 4294901760, %v137_v57 }
  0xd2   :  { %v448_v60 = vpop.f32.mrf.mxu2  ;;  %v527_v29 = vpop.f32.mrf.mxu3  ;;  %1762 = vmatpush.msra.mxu1 %v3261_v18  ;;  %v1927_v53 = vand.u32 4294901760, %v1926_v39  ;;  %v3582_v18 = vand.u32 4294901760, %v138_v58  ;;  %v233_v10 = vadd.f32 %v3318_v54, %v232_v5  ;;  %v4419_v39 = vand.u32 4294901760, %v3344_v16 }
  0xd3   :  { %v449_v23 = vadd.f32 %v448_v60, %v362_v8  ;;  %1084 = vmatmul.f32.gmra.mxu1 %v4417_v12  ;;  %1685 = vmatpush.msra.mxu0 %v4418_v9  ;;  %v1932_v6 = vsub.f32 %v3564_v13, %v4357_v2  ;;  %v24_v60 = vld [vmem:[%s4299_s0 + $0x50] sm:$0xff]  ;;  %v4420_v16 = vand.u32 4294901760, %v3356_v42 }
  0xd4   :  { %1010 = vmatmul.f32.gmra.mxu0 %v3199_v1  ;;  %1764 = vmatpush.msra.mxu1 %v3278_v3  ;;  %v3598_v3 = vsub.f32 %v138_v58, %v3582_v18  ;;  %v3616_v58 = vsub.f32 %v137_v57, %v3605_v61 }
  0xd5   :  { %v3588_v45 = vadd.f32 %v527_v29, %v449_v23  ;;  %1254 = vmatmul.f32.gmra.mxu3 %v3187_v63  ;;  %v1933_v5 = vand.u32 4294901760, %v1932_v6  ;;  %1827 = vmatpush.msra.mxu2 %v3582_v18  ;;  %v56_v6 = vmax.f32 %v24_v60, 0.0 }
  0xd6   :  { %1928 = vmatpush.msra.mxu3 %v1927_v53  ;;  %1766 = vmatpush.msra.mxu1 %v3297_v15  ;;  %v4355_v29 = vand.u32 4294901760, %v3598_v3  ;;  %v3619_v15 = vsub.f32 %v52_v21, %v3595_v0  ;;  %v1297_v21 = vsub.f32 %v3576_v7, %v1296_v19  ;;  %v4347_v57 = vand.u32 4294901760, %v3616_v58 }
  0xd7   :  { %1189 = vmatmul.f32.gmra.mxu2 %v3187_v63  ;;  %1689 = vmatpush.msra.mxu0 %v4419_v39 }
  0xd8   :  { %v365_v8 = vpop.f32.mrf.mxu1  ;;  %1934 = vmatpush.msra.mxu3 %v1933_v5  ;;  %1829 = vmatpush.msra.mxu2 %v3605_v61  ;;  %v1938_v53 = vsub.f32 %v3598_v3, %v4355_v29  ;;  %v1944_v60 = vsub.f32 %v3616_v58, %v4347_v57 }
  0xd9   :  { %v240_v63 = vpop.f32.mrf.mxu0  ;;  %v366_v24 = vadd.f32 %v365_v8, %v233_v10  ;;  %1768 = vmatpush.msra.mxu1 %v3311_v34  ;;  %1693 = vmatpush.msra.mxu0 %v4420_v16  ;;  %v4421_v10 = vand.u32 4294901760, %v3199_v1  ;;  %v136_v34 = vld [vmem:[%s4298_s1 + $0x1d0] sm:$0xff]  ;;  %v4422_v8 = vand.u32 4294901760, %v3382_v32  ;;  %v1298_v32 = vand.u32 4294901760, %v1297_v21 }
  0xda   :  { %v453_v23 = vpop.f32.mrf.mxu2  ;;  %v533_v12 = vpop.f32.mrf.mxu3  ;;  %v1939_v5 = vand.u32 4294901760, %v1938_v53  ;;  %v3637_v42 = vand.u32 4294901760, %v136_v34  ;;  %v241_v1 = vadd.f32 %v3318_v54, %v240_v63  ;;  %v135_v54 = vld [vmem:[%s4298_s1 + $0x1c8] sm:$0xff]  ;;  %v3657_v63 = vand.u32 4294901760, %v56_v6 }
  0xdb   :  { %v454_v9 = vadd.f32 %v453_v23, %v366_v24  ;;  %1090 = vmatmul.f32.gmra.mxu1 %v4421_v10  ;;  %1697 = vmatpush.msra.mxu0 %v4422_v8  ;;  %v1304_v24 = vand.u32 4294901760, %v3619_v15  ;;  %v1945_v23 = vand.u32 4294901760, %v1944_v60  ;;  %v4423_v10 = vand.u32 4294901760, %v3394_v38 }
  0xdc   :  { %1015 = vmatmul.f32.gmra.mxu0 %v3231_v49  ;;  %1770 = vmatpush.msra.mxu1 %v3335_v46  ;;  %v3652_v46 = vsub.f32 %v136_v34, %v3637_v42  ;;  %v4424_v38 = vand.u32 4294901760, %v3420_v59 }
  0xdd   :  { %v3643_v39 = vadd.f32 %v533_v12, %v454_v9  ;;  %1258 = vmatmul.f32.gmra.mxu3 %v3212_v47  ;;  %v28_v12 = vld [vmem:[%s4299_s0 + $0x70] sm:$0xff]  ;;  %1831 = vmatpush.msra.mxu2 %v3637_v42 }
  0xde   :  { %1940 = vmatpush.msra.mxu3 %v1939_v5  ;;  %1772 = vmatpush.msra.mxu1 %v3351_v27  ;;  %v4348_v9 = vand.u32 4294901760, %v3652_v46  ;;  %v1305_v27 = vsub.f32 %v3619_v15, %v1304_v24  ;;  %v60_v60 = vmax.f32 %v28_v12, 0.0  ;;  %v134_v12 = vld [vmem:[%s4298_s1 + $0x1c0] sm:$0xff] }
  0xdf   :  { %1193 = vmatmul.f32.gmra.mxu2 %v3212_v47  ;;  %v3663_v47 = vand.u32 4294901760, %v135_v54  ;;  %1701 = vmatpush.msra.mxu0 %v4423_v10 }
  0xe0   :  { %v369_v53 = vpop.f32.mrf.mxu1  ;;  %1946 = vmatpush.msra.mxu3 %v1945_v23  ;;  %v1950_v57 = vsub.f32 %v3652_v46, %v4348_v9  ;;  %1774 = vmatpush.msra.mxu1 %v3371_v22  ;;  %v4425_v23 = vand.u32 4294901760, %v3231_v49  ;;  %v3691_v9 = vand.u32 4294901760, %v134_v12  ;;  %v4426_v22 = vand.u32 4294901760, %v3432_v41  ;;  %v133_v41 = vld [vmem:[%s4298_s1 + $0x1b8] sm:$0xff] }
  0xe1   :  { %v608_v16 = vpop.f32.mrf.mxu0  ;;  %v370_v21 = vadd.f32 %v369_v53, %v241_v1  ;;  %1833 = vmatpush.msra.mxu2 %v3663_v47  ;;  %v3671_v8 = vsub.f32 %v135_v54, %v3663_v47  ;;  %1705 = vmatpush.msra.mxu0 %v4424_v38  ;;  %v3685_v54 = vsub.f32 %v56_v6, %v3657_v63  ;;  %v1306_v6 = vand.u32 4294901760, %v1305_v27 }
  0xe2   :  { %v458_v34 = vpop.f32.mrf.mxu2  ;;  %v539_v5 = vpop.f32.mrf.mxu3  ;;  %v1951_v10 = vand.u32 4294901760, %v1950_v57  ;;  %1776 = vmatpush.msra.mxu1 %v3389_v36  ;;  %v3704_v57 = vand.u32 4294901760, %v60_v60  ;;  %v3707_v36 = vsub.f32 %v134_v12, %v3691_v9 }
  0xe3   :  { %v459_v1 = vadd.f32 %v458_v34, %v370_v21  ;;  %1096 = vmatmul.f32.gmra.mxu1 %v4425_v23  ;;  %v4354_v53 = vand.u32 4294901760, %v3671_v8  ;;  %1709 = vmatpush.msra.mxu0 %v4426_v22  ;;  %v3718_v34 = vand.u32 4294901760, %v133_v41 }
  0xe4   :  { %1299 = vmatmul.f32.vlgmr.msrb.gmra.mxu0 %v1298_v32  ;;  %1952 = vmatpush.msra.mxu3 %v1951_v10  ;;  %v609_v32 = vadd.f32 %v608_v16, %v3374_v20  ;;  %v4352_v38 = vand.u32 4294901760, %v3707_v36  ;;  %v3729_v10 = vsub.f32 %v60_v60, %v3704_v57 }
  0xe5   :  { %v3696_v49 = vadd.f32 %v539_v5, %v459_v1  ;;  %1612 = vmatmul.f32.vlgmr.msrb.gmra.mxu3 %v1296_v19  ;;  %v1956_v59 = vsub.f32 %v3671_v8, %v4354_v53  ;;  %v1312_v19 = vand.u32 4294901760, %v3685_v54  ;;  %1835 = vmatpush.msra.mxu2 %v3691_v9  ;;  %v4427_v1 = vand.u32 4294901760, %v3461_v44 }
  0xe6   :  { %1778 = vmatpush.msra.mxu1 %v3409_v4  ;;  %v3726_v12 = vsub.f32 %v133_v41, %v3718_v34  ;;  %v1962_v22 = vsub.f32 %v3707_v36, %v4352_v38  ;;  %v132_v41 = vld [vmem:[%s4298_s1 + $0x1b0] sm:$0xff]  ;;  %v1320_v48 = vand.u32 4294901760, %v3729_v10 }
  0xe7   :  { %1538 = vmatmul.f32.vlgmr.msrb.gmra.mxu2 %v3576_v7  ;;  %v1957_v21 = vand.u32 4294901760, %v1956_v59  ;;  %v32_v7 = vld [vmem:[%s4299_s0 + $0x90] sm:$0xff]  ;;  %1713 = vmatpush.msra.mxu0 %v4427_v1  ;;  %v1313_v59 = vsub.f32 %v3685_v54, %v1312_v19 }
  0xe8   :  { %v673_v27 = vpop.f32.mrf.mxu1  ;;  %1837 = vmatpush.msra.mxu2 %v3718_v34  ;;  %v64_v4 = vmax.f32 %v32_v7, 0.0  ;;  %1780 = vmatpush.msra.mxu1 %v3427_v17  ;;  %v4351_v60 = vand.u32 4294901760, %v3726_v12 }
  0xe9   :  { %v612_v5 = vpop.f32.mrf.mxu0  ;;  %v674_v20 = vadd.f32 %v673_v27, %v609_v32  ;;  %1958 = vmatpush.msra.mxu3 %v1957_v21  ;;  %1717 = vmatpush.msra.mxu0 %v1445_v43  ;;  %v1963_v32 = vand.u32 4294901760, %v1962_v22  ;;  %v3745_v21 = vand.u32 4294901760, %v132_v41  ;;  %v3770_v27 = vand.u32 4294901760, %v131_v37 }
  0xea   :  { %v742_v16 = vpop.f32.mrf.mxu2  ;;  %v899_v23 = vpop.f32.mrf.mxu3  ;;  %1782 = vmatpush.msra.mxu1 %v3447_v25  ;;  %v1968_v17 = vsub.f32 %v3726_v12, %v4351_v60 }
  0xeb   :  { %v743_v44 = vadd.f32 %v742_v16, %v674_v20  ;;  %1456 = vmatmul.f32.vlgmr.msrb.gmra.mxu1 %v3550_v50  ;;  %1721 = vmatpush.msra.mxu0 %v1451_v55  ;;  %v3763_v25 = vsub.f32 %v132_v41, %v3745_v21  ;;  %v613_v55 = vadd.f32 %v612_v5, %v3412_v11  ;;  %v36_v20 = vld [vmem:[%s4299_s0 + $0xb0] sm:$0xff] }
  0xec   :  { %1307 = vmatmul.f32.gmra.mxu0 %v1306_v6  ;;  %v3760_v6 = vand.u32 4294901760, %v64_v4  ;;  %1964 = vmatpush.msra.mxu3 %v1963_v32  ;;  %v1969_v7 = vand.u32 4294901760, %v1968_v17  ;;  %v3780_v22 = vsub.f32 %v131_v37, %v3770_v27  ;;  %v68_v32 = vmax.f32 %v36_v20, 0.0 }
  0xed   :  { %v3750_v43 = vadd.f32 %v899_v23, %v743_v44  ;;  %1618 = vmatmul.f32.gmra.mxu3 %v1304_v24  ;;  %2048 = vmatpush.msrb.mxu0 %v3519_v35  ;;  %v1314_v24 = vand.u32 4294901760, %v1313_v59  ;;  %v4350_v16 = vand.u32 4294901760, %v3763_v25 }
  0xee   :  { %1839 = vmatpush.msra.mxu2 %v3745_v21  ;;  %1784 = vmatpush.msra.mxu1 %v3463_v56  ;;  %v1321_v56 = vsub.f32 %v3729_v10, %v1320_v48  ;;  %v3786_v44 = vsub.f32 %v64_v4, %v3760_v6  ;;  %v4349_v17 = vand.u32 4294901760, %v3780_v22  ;;  %v130_v4 = vld [vmem:[%s4298_s1 + $0x1a0] sm:$0xff] }
  0xef   :  { %1543 = vmatmul.f32.gmra.mxu2 %v3619_v15  ;;  %2051 = vmatpush.msrb.mxu0 %v3544_v28  ;;  %v1974_v59 = vsub.f32 %v3763_v25, %v4350_v16 }
  0xf0   :  { %v677_v1 = vpop.f32.mrf.mxu1  ;;  %1970 = vmatpush.msra.mxu3 %v1969_v7  ;;  %1841 = vmatpush.msra.mxu2 %v3770_v27  ;;  %v1322_v7 = vand.u32 4294901760, %v1321_v56 }
  0xf1   :  { %v616_v15 = vpop.f32.mrf.mxu0  ;;  %v678_v23 = vadd.f32 %v677_v1, %v613_v55  ;;  %1786 = vmatpush.msra.mxu1 %v3475_v26  ;;  %2054 = vmatpush.msrb.mxu0 %v3564_v13  ;;  %v1975_v37 = vand.u32 4294901760, %v1974_v59  ;;  %v3798_v55 = vand.u32 4294901760, %v130_v4  ;;  %v4358_v1 = vand.u32 4294901760, %v3786_v44 }
  0xf2   :  { %v750_v11 = vpop.f32.mrf.mxu2  ;;  %v903_v5 = vpop.f32.mrf.mxu3 }
  0xf3   :  { %v751_v41 = vadd.f32 %v750_v11, %v678_v23  ;;  %1460 = vmatmul.f32.gmra.mxu1 %v3595_v0  ;;  %2057 = vmatpush.msrb.mxu0 %v3598_v3  ;;  %v3812_v20 = vsub.f32 %v130_v4, %v3798_v55  ;;  %v129_v23 = vld [vmem:[%s4298_s1 + $0x198] sm:$0xff]  ;;  %v617_v11 = vadd.f32 %v616_v15, %v3450_v30 }
  0xf4   :  { %1315 = vmatmul.f32.gmra.mxu0 %v1314_v24  ;;  %2136 = vmatpush.msrb.mxu1 %v3510_v33  ;;  %v1980_v24 = vsub.f32 %v3780_v22, %v4349_v17  ;;  %v3821_v59 = vand.u32 4294901760, %v129_v23  ;;  %v128_v17 = vld [vmem:[%s4298_s1 + $0x190] sm:$0xff]  ;;  %v1329_v16 = vsub.f32 %v3786_v44, %v4358_v1 }
  0xf5   :  { %v3802_v26 = vadd.f32 %v903_v5, %v751_v41  ;;  %1624 = vmatmul.f32.gmra.mxu3 %v1312_v19  ;;  %v3818_v19 = vand.u32 4294901760, %v68_v32  ;;  %1843 = vmatpush.msra.mxu2 %v3798_v55  ;;  %v3827_v41 = vld [vmem:[%s4299_s0 + $0xd0] sm:$0xff]  ;;  %v4353_v4 = vand.u32 4294901760, %v3812_v20 }
  0xf6   :  { %1976 = vmatpush.msra.mxu3 %v1975_v37  ;;  %v1981_v5 = vand.u32 4294901760, %v1980_v24  ;;  %2138 = vmatpush.msrb.mxu1 %v3531_v31  ;;  %v3833_v24 = vsub.f32 %v129_v23, %v3821_v59  ;;  %v72_v60 = vmax.f32 %v3827_v41, 0.0 }
  0xf7   :  { %1548 = vmatmul.f32.gmra.mxu2 %v3685_v54  ;;  %2060 = vmatpush.msrb.mxu0 %v3616_v58 }
  0xf8   :  { %v681_v56 = vpop.f32.mrf.mxu1  ;;  %1982 = vmatpush.msra.mxu3 %v1981_v5  ;;  %1845 = vmatpush.msra.mxu2 %v3821_v59  ;;  %v3850_v5 = vsub.f32 %v68_v32, %v3818_v19  ;;  %v4356_v38 = vand.u32 4294901760, %v3833_v24 }
  0xf9   :  { %v620_v54 = vpop.f32.mrf.mxu0  ;;  %v682_v30 = vadd.f32 %v681_v56, %v617_v11  ;;  %v1986_v11 = vsub.f32 %v3812_v20, %v4353_v4  ;;  %v3844_v56 = vand.u32 4294901760, %v128_v17  ;;  %2140 = vmatpush.msrb.mxu1 %v3556_v52  ;;  %2063 = vmatpush.msrb.mxu0 %v3652_v46  ;;  %v127_v4 = vld [vmem:[%s4298_s1 + $0x188] sm:$0xff] }
  0xfa   :  { %v758_v15 = vpop.f32.mrf.mxu2  ;;  %v907_v37 = vpop.f32.mrf.mxu3  ;;  %v1992_v41 = vsub.f32 %v3833_v24, %v4356_v38  ;;  %v3884_v38 = vand.u32 4294901760, %v72_v60 }
  0xfb   :  { %v759_v23 = vadd.f32 %v758_v15, %v682_v30  ;;  %1464 = vmatmul.f32.gmra.mxu1 %v3657_v63  ;;  %v1987_v53 = vand.u32 4294901760, %v1986_v11  ;;  %1847 = vmatpush.msra.mxu2 %v3844_v56  ;;  %v3859_v29 = vsub.f32 %v128_v17, %v3844_v56  ;;  %v126_v30 = vld [vmem:[%s4298_s1 + $0x180] sm:$0xff]  ;;  %v1330_v17 = vand.u32 4294901760, %v1329_v16  ;;  %v44_v16 = vld [vmem:[%s4299_s0 + $0xf0] sm:$0xff] }
  0xfc   :  { %1323 = vmatmul.f32.gmra.mxu0 %v1322_v7  ;;  %v3861_v7 = vand.u32 4294901760, %v127_v4  ;;  %2142 = vmatpush.msrb.mxu1 %v3582_v18  ;;  %v621_v11 = vadd.f32 %v620_v54, %v3497_v14  ;;  %v1993_v2 = vand.u32 4294901760, %v1992_v41 }
  0xfd   :  { %v3864_v32 = vadd.f32 %v907_v37, %v759_v23  ;;  %1630 = vmatmul.f32.gmra.mxu3 %v1320_v48  ;;  %2066 = vmatpush.msrb.mxu0 %v3671_v8  ;;  %v4361_v15 = vand.u32 4294901760, %v3859_v29  ;;  %v3880_v48 = vand.u32 4294901760, %v126_v30 }
  0xfe   :  { %1988 = vmatpush.msra.mxu3 %v1987_v53  ;;  %v3878_v37 = vsub.f32 %v127_v4, %v3861_v7  ;;  %1849 = vmatpush.msra.mxu2 %v3861_v7 }
  0xff   :  { %4428 = vst [vmem:[#allocation4_spill] sm:$0xff] %v3864_v32  ;;  %1553 = vmatmul.f32.gmra.mxu2 %v3729_v10  ;;  %2144 = vmatpush.msrb.mxu1 %v3605_v61  ;;  %v1998_v4 = vsub.f32 %v3859_v29, %v4361_v15  ;;  %v3896_v54 = vsub.f32 %v126_v30, %v3880_v48  ;;  %v4429_v32 = vand.u32 4294901760, %v3519_v35 }
 0x100   :  { %v685_v53 = vpop.f32.mrf.mxu1  ;;  %v4362_v14 = vand.u32 4294901760, %v3878_v37  ;;  %2069 = vmatpush.msrb.mxu0 %v3707_v36  ;;  %1994 = vmatpush.msra.mxu3 %v1993_v2  ;;  %v4430_v2 = vand.u32 4294901760, %v3850_v5 }
 0x101   :  { %v624_v10 = vpop.f32.mrf.mxu0  ;;  %v686_v41 = vadd.f32 %v685_v53, %v621_v11  ;;  %1851 = vmatpush.msra.mxu2 %v3880_v48  ;;  %v1999_v23 = vand.u32 4294901760, %v1998_v4  ;;  %v2009_v15 = vand.u32 4294901760, %v3896_v54  ;;  %2146 = vmatpush.msrb.mxu1 %v3637_v42  ;;  %v3912_v53 = vsub.f32 %v72_v60, %v3884_v38 }
 0x102   :  { %v766_v1 = vpop.f32.mrf.mxu2  ;;  %v911_v40 = vpop.f32.mrf.mxu3  ;;  %v2004_v51 = vsub.f32 %v3878_v37, %v4362_v14  ;;  %v1337_v11 = vsub.f32 %v3850_v5, %v4430_v2  ;;  %v76_v4 = vmax.f32 %v44_v16, 0.0  ;;  %2072 = vmatpush.msrb.mxu0 %v3726_v12 }
 0x103   :  { %2219 = vmatpush.msrb.mxu2 %v4429_v32  ;;  %v767_v30 = vadd.f32 %v766_v1, %v686_v41  ;;  %1468 = vmatmul.f32.gmra.mxu1 %v3704_v57  ;;  %v2010_v35 = vsub.f32 %v3896_v54, %v2009_v15  ;;  %v4431_v32 = vand.u32 4294901760, %v3544_v28  ;;  %v1344_v16 = vand.u32 4294901760, %v3912_v53 }
 0x104   :  { %1331 = vmatmul.f32.gmra.mxu0 %v1330_v17  ;;  %2000 = vmatpush.msra.mxu3 %v1999_v23  ;;  %v2005_v14 = vand.u32 4294901760, %v2004_v51  ;;  %v4432_v17 = vand.u32 4294901760, %v3786_v44  ;;  %v625_v51 = vadd.f32 %v624_v10, %v3536_v62  ;;  %v1338_v23 = vand.u32 4294901760, %v1337_v11 }
 0x105   :  { %2223 = vmatpush.msrb.mxu2 %v4431_v32  ;;  %v3919_v1 = vadd.f32 %v911_v40, %v767_v30  ;;  %2148 = vmatpush.msrb.mxu1 %v3663_v47  ;;  %v2011_v60 = vand.u32 4294901760, %v2010_v35  ;;  %v3927_v41 = vand.u32 4294901760, %v76_v4  ;;  %v4433_v28 = vand.u32 4294901760, %v3564_v13 }
 0x106   :  { %1636 = vmatmul.f32.gmra.mxu3 %v4432_v17  ;;  %v4434_v62 = vand.u32 4294901760, %v3598_v3  ;;  %2075 = vmatpush.msrb.mxu0 %v3763_v25  ;;  %v1345_v10 = vsub.f32 %v3912_v53, %v1344_v16  ;;  %v4435_v3 = vand.u32 4294901760, %v3616_v58  ;;  %v4436_v32 = vand.u32 4294901760, %v3850_v5 }
 0x107   :  { %1558 = vmatmul.f32.gmra.mxu2 %v3786_v44  ;;  %2006 = vmatpush.msra.mxu3 %v2005_v14  ;;  %v3941_v11 = vsub.f32 %v76_v4, %v3927_v41  ;;  %v4437_v58 = vand.u32 4294901760, %v3652_v46 }
 0x108   :  { %2227 = vmatpush.msrb.mxu2 %v4433_v28  ;;  %2150 = vmatpush.msrb.mxu1 %v3691_v9  ;;  %v689_v30 = vpop.f32.mrf.mxu1 }
 0x109   :  { %v628_v40 = vpop.f32.mrf.mxu0  ;;  %2012 = vmatpush.msra.mxu3 %v2011_v60  ;;  %v690_v44 = vadd.f32 %v689_v30, %v625_v51  ;;  %v1346_v60 = vand.u32 4294901760, %v1345_v10  ;;  %2078 = vmatpush.msrb.mxu0 %v3780_v22 }
 0x10a   :  { %v774_v14 = vpop.f32.mrf.mxu2  ;;  %v915_v2 = vpop.f32.mrf.mxu3  ;;  %2231 = vmatpush.msrb.mxu2 %v4434_v62  ;;  %2152 = vmatpush.msrb.mxu1 %v3718_v34  ;;  %v629_v17 = vadd.f32 %v628_v40, %v3588_v45  ;;  %v21_v40 = vld [vmem:[%s4299_s0 + $0x38] sm:$0xff] }
 0x10b   :  { %2314 = vmatpush.msrb.mxu3 %v3510_v33  ;;  %v775_v13 = vadd.f32 %v774_v14, %v690_v44  ;;  %1472 = vmatmul.f32.gmra.mxu1 %v3760_v6  ;;  %v17_v33 = vld [vmem:[%s4299_s0 + $0x18] sm:$0xff]  ;;  %v53_v14 = vmax.f32 %v21_v40, 0.0 }
 0x10c   :  { %1339 = vmatmul.f32.gmra.mxu0 %v1338_v23  ;;  %2235 = vmatpush.msrb.mxu2 %v4435_v3  ;;  %v49_v4 = vmax.f32 %v17_v33, 0.0  ;;  %v4441_v33 = vand.u32 4294901760, %v3763_v25  ;;  %v4442_v25 = vand.u32 4294901760, %v3780_v22  ;;  %v4443_v22 = vand.u32 4294901760, %v3812_v20 }
 0x10d   :  { %2316 = vmatpush.msrb.mxu3 %v3531_v31  ;;  %v3949_v35 = vadd.f32 %v915_v2, %v775_v13  ;;  %2154 = vmatpush.msrb.mxu1 %v3745_v21  ;;  %v1352_v31 = vand.u32 4294901760, %v3941_v11 }
 0x10e   :  { %1642 = vmatmul.f32.gmra.mxu3 %v4436_v32  ;;  %2239 = vmatpush.msrb.mxu2 %v4437_v58  ;;  %v3966_v45 = vand.u32 4294901760, %v49_v4 }
 0x10f   :  { %1563 = vmatmul.f32.gmra.mxu2 %v3850_v5  ;;  %2318 = vmatpush.msrb.mxu3 %v3556_v52  ;;  %v4438_v52 = vand.u32 4294901760, %v3671_v8  ;;  %v4439_v8 = vand.u32 4294901760, %v3707_v36 }
 0x110   :  { %v693_v23 = vpop.f32.mrf.mxu1  ;;  %2156 = vmatpush.msrb.mxu1 %v3770_v27  ;;  %2081 = vmatpush.msrb.mxu0 %v3812_v20 }
 0x111   :  { %v632_v51 = vpop.f32.mrf.mxu0  ;;  %2320 = vmatpush.msrb.mxu3 %v3582_v18  ;;  %v694_v5 = vadd.f32 %v693_v23, %v629_v17  ;;  %2243 = vmatpush.msrb.mxu2 %v4438_v52  ;;  %v1353_v18 = vsub.f32 %v3941_v11, %v1352_v31  ;;  %v4446_v52 = vand.u32 4294901760, %v3878_v37 }
 0x112   :  { %v782_v28 = vpop.f32.mrf.mxu2  ;;  %v919_v30 = vpop.f32.mrf.mxu3  ;;  %2158 = vmatpush.msrb.mxu1 %v3798_v55  ;;  %2084 = vmatpush.msrb.mxu0 %v3833_v24  ;;  %v633_v2 = vadd.f32 %v632_v51, %v3643_v39  ;;  %v4444_v51 = vand.u32 4294901760, %v3833_v24  ;;  %v4445_v24 = vand.u32 4294901760, %v3859_v29 }
 0x113   :  { %2322 = vmatpush.msrb.mxu3 %v3605_v61  ;;  %v783_v46 = vadd.f32 %v782_v28, %v694_v5  ;;  %1476 = vmatmul.f32.gmra.mxu1 %v3818_v19  ;;  %v3983_v61 = vsub.f32 %v49_v4, %v3966_v45  ;;  %v1354_v62 = vand.u32 4294901760, %v1353_v18 }
 0x114   :  { %1347 = vmatmul.f32.gmra.mxu0 %v1346_v60  ;;  %2247 = vmatpush.msrb.mxu2 %v4439_v8 }
 0x115   :  { %2324 = vmatpush.msrb.mxu3 %v3637_v42  ;;  %v3978_v44 = vadd.f32 %v919_v30, %v783_v46  ;;  %v4440_v42 = vand.u32 4294901760, %v3726_v12  ;;  %2160 = vmatpush.msrb.mxu1 %v3821_v59  ;;  %v1854_v39 = vand.u32 4294901760, %v3983_v61 }
 0x116   :  { %1648 = vmatmul.f32.gmra.mxu3 %v1344_v16  ;;  %2087 = vmatpush.msrb.mxu0 %v3859_v29 }
 0x117   :  { %1568 = vmatmul.f32.gmra.mxu2 %v3912_v53  ;;  %2326 = vmatpush.msrb.mxu3 %v3663_v47  ;;  %v3996_v47 = vand.u32 4294901760, %v53_v14 }
 0x118   :  { %2251 = vmatpush.msrb.mxu2 %v4440_v42  ;;  %v697_v16 = vpop.f32.mrf.mxu1  ;;  %2162 = vmatpush.msrb.mxu1 %v3844_v56 }
 0x119   :  { %v636_v36 = vpop.f32.mrf.mxu0  ;;  %2328 = vmatpush.msrb.mxu3 %v3691_v9  ;;  %v698_v53 = vadd.f32 %v697_v16, %v633_v2  ;;  %2090 = vmatpush.msrb.mxu0 %v3878_v37  ;;  %v25_v9 = vld [vmem:[%s4299_s0 + $0x58] sm:$0xff]  ;;  %v4015_v32 = vsub.f32 %v53_v14, %v3996_v47 }
 0x11a   :  { %v790_v13 = vpop.f32.mrf.mxu2  ;;  %v923_v10 = vpop.f32.mrf.mxu3  ;;  %2255 = vmatpush.msrb.mxu2 %v4441_v33  ;;  %v57_v4 = vmax.f32 %v25_v9, 0.0  ;;  %2164 = vmatpush.msrb.mxu1 %v3861_v7 }
 0x11b   :  { %2330 = vmatpush.msrb.mxu3 %v3718_v34  ;;  %v791_v12 = vadd.f32 %v790_v13, %v698_v53  ;;  %1480 = vmatmul.f32.gmra.mxu1 %v3884_v38  ;;  %v1855_v34 = vsub.f32 %v3983_v61, %v1854_v39 }
 0x11c   :  { %1355 = vmatmul.f32.gmra.mxu0 %v1354_v62  ;;  %2259 = vmatpush.msrb.mxu2 %v4442_v25  ;;  %v4027_v23 = vand.u32 4294901760, %v57_v4  ;;  %v37_v25 = vld [vmem:[%s4299_s0 + $0xb8] sm:$0xff] }
 0x11d   :  { %2332 = vmatpush.msrb.mxu3 %v3745_v21  ;;  %v4007_v3 = vadd.f32 %v923_v10, %v791_v12  ;;  %2093 = vmatpush.msrb.mxu0 %v3896_v54  ;;  %v637_v21 = vadd.f32 %v636_v36, %v3696_v49  ;;  %v1862_v49 = vand.u32 4294901760, %v4015_v32 }
 0x11e   :  { %1654 = vmatmul.f32.gmra.mxu3 %v1352_v31  ;;  %2263 = vmatpush.msrb.mxu2 %v4443_v22  ;;  %v4045_v28 = vsub.f32 %v57_v4, %v4027_v23  ;;  %v4447_v22 = vld [vmem:[#allocation4_spill] sm:$0xff] }
 0x11f   :  { %1573 = vmatmul.f32.gmra.mxu2 %v3941_v11  ;;  %2334 = vmatpush.msrb.mxu3 %v3770_v27  ;;  %v1856_v27 = vand.u32 4294901760, %v1855_v34 }
 0x120   :  { %v701_v17 = vpop.f32.mrf.mxu1  ;;  %2267 = vmatpush.msrb.mxu2 %v4444_v51  ;;  %2166 = vmatpush.msrb.mxu1 %v3880_v48  ;;  %v1870_v2 = vand.u32 4294901760, %v4045_v28 }
 0x121   :  { %v981_v60 = vpop.f32.mrf.mxu0  ;;  %2336 = vmatpush.msrb.mxu3 %v3798_v55  ;;  %v702_v11 = vadd.f32 %v701_v17, %v637_v21  ;;  %v29_v55 = vld [vmem:[%s4299_s0 + $0x78] sm:$0xff]  ;;  %v69_v21 = vmax.f32 %v37_v25, 0.0 }
 0x122   :  { %v798_v31 = vpop.f32.mrf.mxu2  ;;  %v927_v58 = vpop.f32.mrf.mxu3  ;;  %2271 = vmatpush.msrb.mxu2 %v4445_v24  ;;  %v61_v30 = vmax.f32 %v29_v55, 0.0  ;;  %v982_v29 = vadd.f32 %v981_v60, %v3750_v43  ;;  %v33_v43 = vld [vmem:[%s4299_s0 + $0x98] sm:$0xff] }
 0x123   :  { %2338 = vmatpush.msrb.mxu3 %v3821_v59  ;;  %v799_v20 = vadd.f32 %v798_v31, %v702_v11  ;;  %1484 = vmatmul.f32.gmra.mxu1 %v3927_v41  ;;  %v1863_v59 = vsub.f32 %v4015_v32, %v1862_v49  ;;  %v65_v54 = vmax.f32 %v33_v43, 0.0  ;;  %v41_v24 = vld [vmem:[%s4299_s0 + $0xd8] sm:$0xff] }
 0x124   :  { %1723 = vmatmul.f32.vlgmr.msra.gmra.mxu0 %v3550_v50  ;;  %2275 = vmatpush.msrb.mxu2 %v4446_v52  ;;  %v4055_v62 = vand.u32 4294901760, %v61_v30  ;;  %v73_v52 = vmax.f32 %v41_v24, 0.0 }
 0x125   :  { %2340 = vmatpush.msrb.mxu3 %v3844_v56  ;;  %v4038_v5 = vadd.f32 %v927_v58, %v799_v20  ;;  %v1864_v14 = vand.u32 4294901760, %v1863_v59  ;;  %v4073_v12 = vand.u32 4294901760, %v65_v54  ;;  %v4091_v20 = vand.u32 4294901760, %v69_v21 }
 0x126   :  { %2014 = vmatmul.f32.vlgmr.msra.gmra.mxu3 %v3966_v45  ;;  %2279 = vmatpush.msrb.mxu2 %v2009_v15  ;;  %v1871_v15 = vsub.f32 %v4045_v28, %v1870_v2  ;;  %v4109_v43 = vand.u32 4294901760, %v73_v52 }
 0x127   :  { %1857 = vmatmul.f32.vlgmr.msra.gmra.mxu2 %v1856_v27  ;;  %2342 = vmatpush.msrb.mxu3 %v3861_v7  ;;  %v4087_v4 = vsub.f32 %v65_v54, %v4073_v12  ;;  %v45_v54 = vld [vmem:[%s4299_s0 + $0xf8] sm:$0xff] }
 0x128   :  { %v1055_v46 = vpop.f32.mrf.mxu1  ;;  %v1872_v10 = vand.u32 4294901760, %v1871_v15 }
 0x129   :  { %v986_v56 = vpop.f32.mrf.mxu0  ;;  %2344 = vmatpush.msrb.mxu3 %v3880_v48  ;;  %v1056_v18 = vadd.f32 %v1055_v46, %v982_v29  ;;  %v4069_v48 = vsub.f32 %v61_v30, %v4055_v62  ;;  %v1886_v27 = vand.u32 4294901760, %v4087_v4  ;;  %v4105_v29 = vsub.f32 %v69_v21, %v4091_v20 }
 0x12a   :  { %v1166_v40 = vpop.f32.mrf.mxu2  ;;  %v1231_v8 = vpop.f32.mrf.mxu3  ;;  %v987_v42 = vadd.f32 %v986_v56, %v3802_v26 }
 0x12b   :  { %v1167_v7 = vadd.f32 %v1166_v40, %v1056_v18  ;;  %1788 = vmatmul.f32.vlgmr.msra.gmra.mxu1 %v3550_v50  ;;  %v1878_v33 = vand.u32 4294901760, %v4069_v48  ;;  %v1887_v30 = vsub.f32 %v4087_v4, %v1886_v27 }
 0x12c   :  { %1727 = vmatmul.f32.gmra.mxu0 %v3595_v0 }
 0x12d   :  { %v4062_v37 = vadd.f32 %v1231_v8, %v1167_v7  ;;  %v1879_v34 = vsub.f32 %v4069_v48, %v1878_v33  ;;  %v1894_v7 = vand.u32 4294901760, %v4105_v29 }
 0x12e   :  { %2018 = vmatmul.f32.gmra.mxu3 %v3996_v47 }
 0x12f   :  { %1865 = vmatmul.f32.gmra.mxu2 %v1864_v14  ;;  %v1880_v51 = vand.u32 4294901760, %v1879_v34  ;;  %v1888_v14 = vand.u32 4294901760, %v1887_v30 }
 0x130   :  { %v1061_v36 = vpop.f32.mrf.mxu1 }
 0x131   :  { %v991_v50 = vpop.f32.mrf.mxu0  ;;  %v1062_v16 = vadd.f32 %v1061_v36, %v987_v42  ;;  %v1895_v42 = vsub.f32 %v4105_v29, %v1894_v7  ;;  %v77_v36 = vmax.f32 %v45_v54, 0.0 }
 0x132   :  { %v1170_v53 = vpop.f32.mrf.mxu2  ;;  %v1235_v13 = vpop.f32.mrf.mxu3  ;;  %v992_v17 = vadd.f32 %v991_v50, %v4447_v22  ;;  %v4123_v50 = vsub.f32 %v73_v52, %v4109_v43 }
 0x133   :  { %v1171_v9 = vadd.f32 %v1170_v53, %v1062_v16  ;;  %1792 = vmatmul.f32.gmra.mxu1 %v3595_v0  ;;  %v1896_v25 = vand.u32 4294901760, %v1895_v42  ;;  %v4127_v21 = vand.u32 4294901760, %v77_v36 }
 0x134   :  { %1731 = vmatmul.f32.gmra.mxu0 %v3657_v63  ;;  %v1902_v34 = vand.u32 4294901760, %v4123_v50 }
 0x135   :  { %v4080_v26 = vadd.f32 %v1235_v13, %v1171_v9 }
 0x136   :  { %2022 = vmatmul.f32.gmra.mxu3 %v4027_v23 }
 0x137   :  { %1873 = vmatmul.f32.gmra.mxu2 %v1872_v10 }
 0x138   :  { %v1067_v60 = vpop.f32.mrf.mxu1 }
 0x139   :  { %v996_v0 = vpop.f32.mrf.mxu0  ;;  %v1068_v11 = vadd.f32 %v1067_v60, %v992_v17 }
 0x13a   :  { %v1174_v31 = vpop.f32.mrf.mxu2  ;;  %v1239_v58 = vpop.f32.mrf.mxu3  ;;  %v997_v56 = vadd.f32 %v996_v0, %v3919_v1  ;;  %v4138_v0 = vsub.f32 %v77_v36, %v4127_v21 }
 0x13b   :  { %v1175_v55 = vadd.f32 %v1174_v31, %v1068_v11  ;;  %1796 = vmatmul.f32.gmra.mxu1 %v3657_v63 }
 0x13c   :  { %1735 = vmatmul.f32.gmra.mxu0 %v3704_v57  ;;  %v1910_v24 = vand.u32 4294901760, %v4138_v0 }
 0x13d   :  { %v4098_v59 = vadd.f32 %v1239_v58, %v1175_v55 }
 0x13e   :  { %2026 = vmatmul.f32.gmra.mxu3 %v4055_v62 }
 0x13f   :  { %1881 = vmatmul.f32.gmra.mxu2 %v1880_v51 }
 0x140   :  { %v1073_v46 = vpop.f32.mrf.mxu1 }
 0x141   :  { %v1001_v63 = vpop.f32.mrf.mxu0  ;;  %v1074_v18 = vadd.f32 %v1073_v46, %v997_v56 }
 0x142   :  { %v1178_v40 = vpop.f32.mrf.mxu2  ;;  %v1243_v8 = vpop.f32.mrf.mxu3  ;;  %v1002_v16 = vadd.f32 %v1001_v63, %v3949_v35  ;;  %v1903_v35 = vsub.f32 %v4123_v50, %v1902_v34 }
 0x143   :  { %v1179_v15 = vadd.f32 %v1178_v40, %v1074_v18  ;;  %1800 = vmatmul.f32.gmra.mxu1 %v3704_v57 }
 0x144   :  { %1739 = vmatmul.f32.gmra.mxu0 %v3760_v6 }
 0x145   :  { %v4116_v1 = vadd.f32 %v1243_v8, %v1179_v15 }
 0x146   :  { %2030 = vmatmul.f32.gmra.mxu3 %v4073_v12 }
 0x147   :  { %1889 = vmatmul.f32.gmra.mxu2 %v1888_v14 }
 0x148   :  { %v1079_v53 = vpop.f32.mrf.mxu1 }
 0x149   :  { %v1006_v57 = vpop.f32.mrf.mxu0  ;;  %v1080_v13 = vadd.f32 %v1079_v53, %v1002_v16 }
 0x14a   :  { %v1182_v10 = vpop.f32.mrf.mxu2  ;;  %v1247_v9 = vpop.f32.mrf.mxu3  ;;  %v1007_v60 = vadd.f32 %v1006_v57, %v3978_v44  ;;  %v1911_v44 = vsub.f32 %v4138_v0, %v1910_v24 }
 0x14b   :  { %v1183_v22 = vadd.f32 %v1182_v10, %v1080_v13  ;;  %1804 = vmatmul.f32.gmra.mxu1 %v3760_v6  ;;  %v1904_v6 = vand.u32 4294901760, %v1903_v35 }
 0x14c   :  { %1743 = vmatmul.f32.gmra.mxu0 %v3818_v19  ;;  %v1912_v14 = vand.u32 4294901760, %v1911_v44 }
 0x14d   :  { %v4131_v17 = vadd.f32 %v1247_v9, %v1183_v22 }
 0x14e   :  { %2034 = vmatmul.f32.gmra.mxu3 %v4091_v20 }
 0x14f   :  { %1897 = vmatmul.f32.gmra.mxu2 %v1896_v25 }
 0x150   :  { %v1085_v31 = vpop.f32.mrf.mxu1 }
 0x151   :  { %v1011_v11 = vpop.f32.mrf.mxu0  ;;  %v1086_v58 = vadd.f32 %v1085_v31, %v1007_v60 }
 0x152   :  { %v1186_v51 = vpop.f32.mrf.mxu2  ;;  %v1251_v55 = vpop.f32.mrf.mxu3  ;;  %v1012_v56 = vadd.f32 %v1011_v11, %v4007_v3 }
 0x153   :  { %v1187_v30 = vadd.f32 %v1186_v51, %v1086_v58  ;;  %1808 = vmatmul.f32.gmra.mxu1 %v3818_v19 }
 0x154   :  { %1747 = vmatmul.f32.gmra.mxu0 %v3884_v38 }
 0x155   :  { %v4144_v52 = vadd.f32 %v1251_v55, %v1187_v30 }
 0x156   :  { %2038 = vmatmul.f32.gmra.mxu3 %v4109_v43 }
 0x157   :  { %1905 = vmatmul.f32.gmra.mxu2 %v1904_v6 }
 0x158   :  { %v1091_v46 = vpop.f32.mrf.mxu1 }
 0x159   :  { %v1016_v63 = vpop.f32.mrf.mxu0  ;;  %v1092_v18 = vadd.f32 %v1091_v46, %v1012_v56 }
 0x15a   :  { %v1190_v40 = vpop.f32.mrf.mxu2  ;;  %v1255_v8 = vpop.f32.mrf.mxu3  ;;  %v1017_v54 = vadd.f32 %v1016_v63, %v4038_v5 }
 0x15b   :  { %v1191_v15 = vadd.f32 %v1190_v40, %v1092_v18  ;;  %1812 = vmatmul.f32.gmra.mxu1 %v3884_v38 }
 0x15c   :  { %1751 = vmatmul.f32.gmra.mxu0 %v3927_v41 }
 0x15d   :  { %v4153_v19 = vadd.f32 %v1255_v8, %v1191_v15 }
 0x15e   :  { %2042 = vmatmul.f32.gmra.mxu3 %v4127_v21 }
 0x15f   :  { %1913 = vmatmul.f32.gmra.mxu2 %v1912_v14 }
 0x160   :  { %v1097_v42 = vpop.f32.mrf.mxu1 }
 0x161   :  { %v1300_v3 = vpop.f32.mrf.mxu0  ;;  %v1098_v36 = vadd.f32 %v1097_v42, %v1017_v54 }
 0x162   :  { %v1301_v16 = vadd.f32 %v1300_v3, %v4062_v37  ;;  %v1194_v57 = vpop.f32.mrf.mxu2  ;;  %v1259_v53 = vpop.f32.mrf.mxu3 }
 0x163   :  { %v1195_v13 = vadd.f32 %v1194_v57, %v1098_v36  ;;  %1816 = vmatmul.f32.gmra.mxu1 %v3927_v41 }
 0x164   :  { %2096 = vmatmul.f32.vlgmr.msrb.gmra.mxu0 %v3983_v61 }
 0x165   :  { %v4160_v38 = vadd.f32 %v1259_v53, %v1195_v13 }
 0x166   :  { %2346 = vmatmul.f32.vlgmr.msrb.gmra.mxu3 %v3966_v45 }
 0x167   :  { %2281 = vmatmul.f32.vlgmr.msrb.gmra.mxu2 %v3966_v45 }
 0x168   :  { %v1457_v5 = vpop.f32.mrf.mxu1 }
 0x169   :  { %v1308_v10 = vpop.f32.mrf.mxu0  ;;  %v1458_v25 = vadd.f32 %v1457_v5, %v1301_v16 }
 0x16a   :  { %v1309_v9 = vadd.f32 %v1308_v10, %v4080_v26  ;;  %v1539_v22 = vpop.f32.mrf.mxu2  ;;  %v1613_v37 = vpop.f32.mrf.mxu3 }
 0x16b   :  { %v1540_v35 = vadd.f32 %v1539_v22, %v1458_v25  ;;  %2170 = vmatmul.f32.vlgmr.msrb.gmra.mxu1 %v1854_v39 }
 0x16c   :  { %2101 = vmatmul.f32.gmra.mxu0 %v4015_v32 }
 0x16d   :  { %v4168_v41 = vadd.f32 %v1613_v37, %v1540_v35 }
 0x16e   :  { %2350 = vmatmul.f32.gmra.mxu3 %v3996_v47 }
 0x16f   :  { %2285 = vmatmul.f32.gmra.mxu2 %v3996_v47 }
 0x170   :  { %v1461_v60 = vpop.f32.mrf.mxu1 }
 0x171   :  { %v1316_v45 = vpop.f32.mrf.mxu0  ;;  %v1462_v26 = vadd.f32 %v1461_v60, %v1309_v9 }
 0x172   :  { %v1317_v11 = vadd.f32 %v1316_v45, %v4098_v59  ;;  %v1544_v31 = vpop.f32.mrf.mxu2  ;;  %v1619_v58 = vpop.f32.mrf.mxu3 }
 0x173   :  { %v1545_v51 = vadd.f32 %v1544_v31, %v1462_v26  ;;  %2176 = vmatmul.f32.gmra.mxu1 %v1862_v49 }
 0x174   :  { %2106 = vmatmul.f32.gmra.mxu0 %v4045_v28 }
 0x175   :  { %v4176_v61 = vadd.f32 %v1619_v58, %v1545_v51 }
 0x176   :  { %2354 = vmatmul.f32.gmra.mxu3 %v4027_v23 }
 0x177   :  { %2289 = vmatmul.f32.gmra.mxu2 %v4027_v23 }
 0x178   :  { %v1465_v47 = vpop.f32.mrf.mxu1 }
 0x179   :  { %v1324_v39 = vpop.f32.mrf.mxu0  ;;  %v1466_v59 = vadd.f32 %v1465_v47, %v1317_v11 }
 0x17a   :  { %v1325_v55 = vadd.f32 %v1324_v39, %v4116_v1  ;;  %v1549_v6 = vpop.f32.mrf.mxu2  ;;  %v1625_v30 = vpop.f32.mrf.mxu3 }
 0x17b   :  { %v1550_v44 = vadd.f32 %v1549_v6, %v1466_v59  ;;  %2182 = vmatmul.f32.gmra.mxu1 %v1870_v2 }
 0x17c   :  { %2111 = vmatmul.f32.gmra.mxu0 %v4069_v48 }
 0x17d   :  { %v4184_v32 = vadd.f32 %v1625_v30, %v1550_v44 }
 0x17e   :  { %2358 = vmatmul.f32.gmra.mxu3 %v4055_v62 }
 0x17f   :  { %2293 = vmatmul.f32.gmra.mxu2 %v4055_v62 }
 0x180   :  { %v1469_v23 = vpop.f32.mrf.mxu1 }
 0x181   :  { %v1332_v49 = vpop.f32.mrf.mxu0  ;;  %v1470_v1 = vadd.f32 %v1469_v23, %v1325_v55 }
 0x182   :  { %v1333_v56 = vadd.f32 %v1332_v49, %v4131_v17  ;;  %v1554_v63 = vpop.f32.mrf.mxu2  ;;  %v1631_v46 = vpop.f32.mrf.mxu3 }
 0x183   :  { %v1555_v18 = vadd.f32 %v1554_v63, %v1470_v1  ;;  %2188 = vmatmul.f32.gmra.mxu1 %v1878_v33 }
 0x184   :  { %2116 = vmatmul.f32.gmra.mxu0 %v4087_v4 }
 0x185   :  { %v4192_v28 = vadd.f32 %v1631_v46, %v1555_v18 }
 0x186   :  { %2362 = vmatmul.f32.gmra.mxu3 %v4073_v12 }
 0x187   :  { %2297 = vmatmul.f32.gmra.mxu2 %v4073_v12 }
 0x188   :  { %v1473_v62 = vpop.f32.mrf.mxu1 }
 0x189   :  { %v1340_v2 = vpop.f32.mrf.mxu0  ;;  %v1474_v17 = vadd.f32 %v1473_v62, %v1333_v56 }
 0x18a   :  { %v1341_v40 = vadd.f32 %v1340_v2, %v4144_v52  ;;  %v1559_v8 = vpop.f32.mrf.mxu2  ;;  %v1637_v14 = vpop.f32.mrf.mxu3 }
 0x18b   :  { %v1560_v15 = vadd.f32 %v1559_v8, %v1474_v17  ;;  %2194 = vmatmul.f32.gmra.mxu1 %v1886_v27 }
 0x18c   :  { %2121 = vmatmul.f32.gmra.mxu0 %v4105_v29 }
 0x18d   :  { %v4200_v48 = vadd.f32 %v1637_v14, %v1560_v15 }
 0x18e   :  { %2366 = vmatmul.f32.gmra.mxu3 %v4091_v20 }
 0x18f   :  { %2301 = vmatmul.f32.gmra.mxu2 %v4091_v20 }
 0x190   :  { %v1477_v12 = vpop.f32.mrf.mxu1 }
 0x191   :  { %v1348_v33 = vpop.f32.mrf.mxu0  ;;  %v1478_v52 = vadd.f32 %v1477_v12, %v1341_v40 }
 0x192   :  { %v1349_v54 = vadd.f32 %v1348_v33, %v4153_v19  ;;  %v1564_v42 = vpop.f32.mrf.mxu2  ;;  %v1643_v3 = vpop.f32.mrf.mxu3 }
 0x193   :  { %v1565_v36 = vadd.f32 %v1564_v42, %v1478_v52  ;;  %2200 = vmatmul.f32.gmra.mxu1 %v1894_v7 }
 0x194   :  { %2126 = vmatmul.f32.gmra.mxu0 %v4123_v50 }
 0x195   :  { %v4208_v4 = vadd.f32 %v1643_v3, %v1565_v36 }
 0x196   :  { %2370 = vmatmul.f32.gmra.mxu3 %v4109_v43 }
 0x197   :  { %2305 = vmatmul.f32.gmra.mxu2 %v4109_v43 }
 0x198   :  { %v1481_v20 = vpop.f32.mrf.mxu1 }
 0x199   :  { %v1356_v27 = vpop.f32.mrf.mxu0  ;;  %v1482_v19 = vadd.f32 %v1481_v20, %v1349_v54 }
 0x19a   :  { %v1357_v16 = vadd.f32 %v1356_v27, %v4160_v38  ;;  %v1569_v57 = vpop.f32.mrf.mxu2  ;;  %v1649_v53 = vpop.f32.mrf.mxu3 }
 0x19b   :  { %v1570_v13 = vadd.f32 %v1569_v57, %v1482_v19  ;;  %2206 = vmatmul.f32.gmra.mxu1 %v1902_v34 }
 0x19c   :  { %2131 = vmatmul.f32.gmra.mxu0 %v4138_v0 }
 0x19d   :  { %v4216_v29 = vadd.f32 %v1649_v53, %v1570_v13 }
 0x19e   :  { %2374 = vmatmul.f32.gmra.mxu3 %v4127_v21 }
 0x19f   :  { %2309 = vmatmul.f32.gmra.mxu2 %v4127_v21 }
 0x1a0   :  { %v1485_v7 = vpop.f32.mrf.mxu1 }
 0x1a1   :  { %v1724_v43 = vpop.f32.mrf.mxu0  ;;  %v1486_v10 = vadd.f32 %v1485_v7, %v1357_v16 }
 0x1a2   :  { %v1574_v5 = vpop.f32.mrf.mxu2  ;;  %v1655_v38 = vpop.f32.mrf.mxu3  ;;  %v1725_v18 = vadd.f32 %v1724_v43, %v4168_v41 }
 0x1a3   :  { %v1575_v9 = vadd.f32 %v1574_v5, %v1486_v10  ;;  %2212 = vmatmul.f32.gmra.mxu1 %v1910_v24 }
 0x1a5   :  { %v4222_v25 = vadd.f32 %v1655_v38, %v1575_v9 }
 0x1a8   :  { %v1789_v50 = vpop.f32.mrf.mxu1 }
 0x1a9   :  { %v1728_v22 = vpop.f32.mrf.mxu0  ;;  %v1790_v2 = vadd.f32 %v1789_v50, %v1725_v18 }
 0x1aa   :  { %v1858_v34 = vpop.f32.mrf.mxu2  ;;  %v2015_v37 = vpop.f32.mrf.mxu3  ;;  %v1729_v15 = vadd.f32 %v1728_v22, %v4176_v61 }
 0x1ab   :  { %v1859_v17 = vadd.f32 %v1858_v34, %v1790_v2 }
 0x1ad   :  { %v2016_v33 = vadd.f32 %v2015_v37, %v1859_v17 }
 0x1b0   :  { %v1793_v45 = vpop.f32.mrf.mxu1 }
 0x1b1   :  { %v1732_v35 = vpop.f32.mrf.mxu0  ;;  %v1794_v12 = vadd.f32 %v1793_v45, %v1729_v15 }
 0x1b2   :  { %v1866_v60 = vpop.f32.mrf.mxu2  ;;  %v2019_v11 = vpop.f32.mrf.mxu3  ;;  %v1733_v20 = vadd.f32 %v1732_v35, %v4184_v32 }
 0x1b3   :  { %v1867_v3 = vadd.f32 %v1866_v60, %v1794_v12 }
 0x1b5   :  { %v2020_v19 = vadd.f32 %v2019_v11, %v1867_v3 }
 0x1b8   :  { %v1797_v26 = vpop.f32.mrf.mxu1 }
 0x1b9   :  { %v1736_v21 = vpop.f32.mrf.mxu0  ;;  %v1798_v57 = vadd.f32 %v1797_v26, %v1733_v20 }
 0x1ba   :  { %v1874_v31 = vpop.f32.mrf.mxu2  ;;  %v2023_v58 = vpop.f32.mrf.mxu3  ;;  %v1737_v22 = vadd.f32 %v1736_v21, %v4192_v28 }
 0x1bb   :  { %v1875_v61 = vadd.f32 %v1874_v31, %v1798_v57 }
 0x1bd   :  { %v2024_v32 = vadd.f32 %v2023_v58, %v1875_v61 }
 0x1c0   :  { %v1801_v39 = vpop.f32.mrf.mxu1 }
 0x1c1   :  { %v1740_v51 = vpop.f32.mrf.mxu0  ;;  %v1802_v34 = vadd.f32 %v1801_v39, %v1737_v22 }
 0x1c2   :  { %v1882_v47 = vpop.f32.mrf.mxu2  ;;  %v2027_v55 = vpop.f32.mrf.mxu3 }
 0x1c3   :  { %v1883_v26 = vadd.f32 %v1882_v47, %v1802_v34 }
 0x1c5   :  { %v2028_v28 = vadd.f32 %v2027_v55, %v1883_v26 }
 0x1c8   :  { %v1805_v24 = vpop.f32.mrf.mxu1 }
 0x1c9   :  { %v4224_v0 = vpop.f32.mrf.mxu0 }
 0x1ca   :  { %v4226_v59 = vpop.f32.mrf.mxu2  ;;  %v4228_v6 = vpop.f32.mrf.mxu3 }
 0x1d0   :  { %v4232_v44 = vpop.f32.mrf.mxu1 }
 0x1d1   :  { %v4230_v30 = vpop.f32.mrf.mxu0 }
 0x1d2   :  { %v4234_v49 = vpop.f32.mrf.mxu2  ;;  %v4236_v23 = vpop.f32.mrf.mxu3 }
 0x1d8   :  { %v4240_v1 = vpop.f32.mrf.mxu1 }
 0x1d9   :  { %v4238_v56 = vpop.f32.mrf.mxu0 }
 0x1da   :  { %v4242_v63 = vpop.f32.mrf.mxu2  ;;  %v4244_v46 = vpop.f32.mrf.mxu3 }
 0x1e0   :  { %v4247_v62 = vpop.f32.mrf.mxu1 }
 0x1e1   :  { %v2097_v40 = vpop.f32.mrf.mxu0 }
 0x1e2   :  { %v4249_v8 = vpop.f32.mrf.mxu2  ;;  %v4251_v14 = vpop.f32.mrf.mxu3  ;;  %v2098_v54 = vadd.f32 %v2097_v40, %v2016_v33  ;;  %v1741_v40 = vadd.f32 %v1740_v51, %v4200_v48  ;;  %v1745_v48 = vadd.f32 %v4224_v0, %v4208_v4  ;;  %v1749_v4 = vadd.f32 %v4230_v30, %v4216_v29 }
 0x1e3   :  { %v1753_v29 = vadd.f32 %v4238_v56, %v4222_v25 }
 0x1e4   :  { %v1806_v21 = vadd.f32 %v1805_v24, %v1741_v40  ;;  %v1810_v24 = vadd.f32 %v4232_v44, %v1745_v48  ;;  %v1814_v44 = vadd.f32 %v4240_v1, %v1749_v4 }
 0x1e5   :  { %v1818_v1 = vadd.f32 %v4247_v62, %v1753_v29 }
 0x1e6   :  { %v1899_v20 = vadd.f32 %v4234_v49, %v1810_v24  ;;  %v1907_v49 = vadd.f32 %v4242_v63, %v1814_v44 }
 0x1e8   :  { %v2171_v42 = vpop.f32.mrf.mxu1 }
 0x1e9   :  { %v2102_v52 = vpop.f32.mrf.mxu0  ;;  %v2172_v36 = vadd.f32 %v2171_v42, %v2098_v54  ;;  %v1891_v54 = vadd.f32 %v4226_v59, %v1806_v21 }
 0x1ea   :  { %v2282_v27 = vpop.f32.mrf.mxu2  ;;  %v2347_v41 = vpop.f32.mrf.mxu3  ;;  %v2103_v13 = vadd.f32 %v2102_v52, %v2020_v19 }
 0x1eb   :  { %v2283_v16 = vadd.f32 %v2282_v27, %v2172_v36  ;;  %v2032_v55 = vadd.f32 %v4228_v6, %v1891_v54  ;;  %v2036_v6 = vadd.f32 %v4236_v23, %v1899_v20  ;;  %v2040_v23 = vadd.f32 %v4244_v46, %v1907_v49 }
 0x1ed   :  { %v2348_v53 = vadd.f32 %v2347_v41, %v2283_v16 }
 0x1ef   :  { %v2378_v7 = vmax.f32 %v2348_v53, 0.0 }
 0x1f0   :  { %v2177_v10 = vpop.f32.mrf.mxu1 }
 0x1f1   :  { %v2107_v43 = vpop.f32.mrf.mxu0  ;;  %2386 = vst [vmem:[%s4301_s3] sm:$0xff] %v2378_v7  ;;  %v2178_v5 = vadd.f32 %v2177_v10, %v2103_v13 }
 0x1f2   :  { %v2286_v38 = vpop.f32.mrf.mxu2  ;;  %v2351_v9 = vpop.f32.mrf.mxu3  ;;  %v2108_v35 = vadd.f32 %v2107_v43, %v2024_v32  ;;  %v1915_v32 = vadd.f32 %v4249_v8, %v1818_v1 }
 0x1f3   :  { %v2287_v50 = vadd.f32 %v2286_v38, %v2178_v5 }
 0x1f4   :  { %v2044_v56 = vadd.f32 %v4251_v14, %v1915_v32 }
 0x1f5   :  { %v2352_v37 = vadd.f32 %v2351_v9, %v2287_v50 }
 0x1f7   :  { %v2379_v45 = vmax.f32 %v2352_v37, 0.0 }
 0x1f8   :  { %v2183_v11 = vpop.f32.mrf.mxu1 }
 0x1f9   :  { %v2112_v60 = vpop.f32.mrf.mxu0  ;;  %2387 = vst [vmem:[%s4301_s3 + $0x8] sm:$0xff] %v2379_v45  ;;  %v2184_v31 = vadd.f32 %v2183_v11, %v2108_v35 }
 0x1fa   :  { %v2290_v18 = vpop.f32.mrf.mxu2  ;;  %v2355_v2 = vpop.f32.mrf.mxu3  ;;  %v2113_v39 = vadd.f32 %v2112_v60, %v2028_v28 }
 0x1fb   :  { %v2291_v17 = vadd.f32 %v2290_v18, %v2184_v31 }
 0x1fd   :  { %v2356_v58 = vadd.f32 %v2355_v2, %v2291_v17 }
 0x1ff   :  { %v2380_v15 = vmax.f32 %v2356_v58, 0.0 }
 0x200   :  { %v2189_v12 = vpop.f32.mrf.mxu1 }
 0x201   :  { %v2117_v33 = vpop.f32.mrf.mxu0  ;;  %2388 = vst [vmem:[%s4301_s3 + $0x10] sm:$0xff] %v2380_v15  ;;  %v2190_v47 = vadd.f32 %v2189_v12, %v2113_v39 }
 0x202   :  { %v2294_v52 = vpop.f32.mrf.mxu2  ;;  %v2359_v42 = vpop.f32.mrf.mxu3  ;;  %v2118_v36 = vadd.f32 %v2117_v33, %v2032_v55 }
 0x203   :  { %v2295_v51 = vadd.f32 %v2294_v52, %v2190_v47 }
 0x205   :  { %v2360_v3 = vadd.f32 %v2359_v42, %v2295_v51 }
 0x207   :  { %v2381_v27 = vmax.f32 %v2360_v3, 0.0 }
 0x208   :  { %v2195_v59 = vpop.f32.mrf.mxu1 }
 0x209   :  { %v2122_v41 = vpop.f32.mrf.mxu0  ;;  %2389 = vst [vmem:[%s4301_s3 + $0x18] sm:$0xff] %v2381_v27  ;;  %v2196_v16 = vadd.f32 %v2195_v59, %v2118_v36 }
 0x20a   :  { %v2298_v19 = vpop.f32.mrf.mxu2  ;;  %v2363_v57 = vpop.f32.mrf.mxu3  ;;  %v2123_v13 = vadd.f32 %v2122_v41, %v2036_v6 }
 0x20b   :  { %v2299_v0 = vadd.f32 %v2298_v19, %v2196_v16 }
 0x20d   :  { %v2364_v53 = vadd.f32 %v2363_v57, %v2299_v0 }
 0x20f   :  { %v2382_v7 = vmax.f32 %v2364_v53, 0.0 }
 0x210   :  { %v2201_v43 = vpop.f32.mrf.mxu1 }
 0x211   :  { %2390 = vst [vmem:[%s4301_s3 + $0x20] sm:$0xff] %v2382_v7  ;;  %v2202_v10 = vadd.f32 %v2201_v43, %v2123_v13  ;;  %v2127_v38 = vpop.f32.mrf.mxu0 }
 0x212   :  { %v2302_v61 = vpop.f32.mrf.mxu2  ;;  %v2367_v5 = vpop.f32.mrf.mxu3  ;;  %v2128_v22 = vadd.f32 %v2127_v38, %v2040_v23 }
 0x213   :  { %v2303_v30 = vadd.f32 %v2302_v61, %v2202_v10 }
 0x215   :  { %v2368_v9 = vadd.f32 %v2367_v5, %v2303_v30 }
 0x217   :  { %v2383_v50 = vmax.f32 %v2368_v9, 0.0 }
 0x218   :  { %v2207_v63 = vpop.f32.mrf.mxu1 }
 0x219   :  { %2391 = vst [vmem:[%s4301_s3 + $0x28] sm:$0xff] %v2383_v50  ;;  %v2208_v34 = vadd.f32 %v2207_v63, %v2128_v22  ;;  %v2132_v25 = vpop.f32.mrf.mxu0 }
 0x21a   :  { %v2306_v37 = vpop.f32.mrf.mxu2  ;;  %v2371_v35 = vpop.f32.mrf.mxu3  ;;  %v2133_v60 = vadd.f32 %v2132_v25, %v2044_v56 }
 0x21b   :  { %v2307_v45 = vadd.f32 %v2306_v37, %v2208_v34 }
 0x21d   :  { %v2372_v46 = vadd.f32 %v2371_v35, %v2307_v45 }
 0x21f   :  { %v2384_v62 = vmax.f32 %v2372_v46, 0.0 }
 0x220   :  { %v2213_v11 = vpop.f32.mrf.mxu1 }
 0x221   :  { %2392 = vst [vmem:[%s4301_s3 + $0x30] sm:$0xff] %v2384_v62  ;;  %v2214_v8 = vadd.f32 %v2213_v11, %v2133_v60 }
 0x222   :  { %v2310_v26 = vpop.f32.mrf.mxu2  ;;  %v2375_v31 = vpop.f32.mrf.mxu3 }
 0x223   :  { %v2311_v18 = vadd.f32 %v2310_v26, %v2214_v8 }
 0x225   :  { %v2376_v2 = vadd.f32 %v2375_v31, %v2311_v18 }
 0x227   :  { %v2385_v40 = vmax.f32 %v2376_v2, 0.0 }
 0x229   :  { %2393 = vst [vmem:[%s4301_s3 + $0x38] sm:$0xff] %v2385_v40 }

</bundles_post_ra>
